<compile_context>
chip_gen: v6e
topology: v6e:2x2x1
jax: 0.10.0
libtpu: 0.0.40
codegen_flags: <defaults>
</compile_context>

<pallas_src>
import functools
import math

import jax
import jax.numpy as jnp
from jax.experimental import pallas as pl
from jax.experimental.pallas import tpu as pltpu

# -------------------- model dims (small, consistent with the module) -------
BATCH = 4
SEQ_LEN = 8
INPUT_SIZE = 64
HIDDEN_SIZE = 32
NUM_LAYERS = 3
FC_MID = 32
NUM_CLASSES = 3


# -------------------- fused kernel ------------------------------------------
def _fused_lstm_fc_kernel(x_ref,
                          wih0_ref, whh0_ref, b0_ref,
                          wcat1_ref, b1_ref,
                          wcat2_ref, b2_ref,
                          fc1w_ref, fc1b_ref,
                          fc2w_ref, fc2b_ref,
                          fc3w_ref, fc3b_ref,
                          out_ref,
                          gx_sc,
                          *, seq_len, batch, hidden):
    """Fused 3-layer LSTM + (Linear, Tanh, Linear, Hardtanh, Linear, Softmax).

    x_ref:     (B*T, In) f32   batch-major flattened input (row b*T + t)
    wih0/whh0: (In,4H)/(H,4H)  bf16, columns pre-scaled 0.5 on i/f/o
    wcat1/2:   (2H, 4H)        bf16, rows = [W_hh ; W_ih], same pre-scale
    b*:        (1, 4H)  f32    pre-summed (b_ih + b_hh), i/f/o pre-scaled 0.5
    fc*w:      (in, out) bf16  pre-transposed FC weights; fc*b (1, out) f32
    out_ref:   (B, 3)   f32    softmax output
    gx_sc:     (B*T, 4H) f32   hoisted layer-0 input projection (VMEM scratch)
    """
    T, B, H = seq_len, batch, hidden
    fourH = 4 * H
    bf16 = jnp.bfloat16

    # Hoisted constants for the single-tanh gate trick:
    #   sigmoid(z) = 0.5 * tanh(z / 2) + 0.5   (i/f/o columns carry the /2
    #   via the 0.5 weight pre-scale; g columns are untouched -> plain tanh).
    lane = jax.lax.broadcasted_iota(jnp.int32, (B, fourH), dimension=1)
    g_col = (lane >= 2 * H) & (lane < 3 * H)
    gate_scale = jnp.where(g_col, 1.0, 0.5).astype(jnp.float32)
    gate_off = jnp.where(g_col, 0.0, 0.5).astype(jnp.float32)

    def cell(gates, c):
        th = jnp.tanh(gates)                 # single EUP transcendental / step
        act = th * gate_scale + gate_off     # full-vreg VPU fma fixup
        i_g = act[:, 0 * H:1 * H]
        f_g = act[:, 1 * H:2 * H]
        g_g = act[:, 2 * H:3 * H]
        o_g = act[:, 3 * H:4 * H]
        c_new = f_g * c + i_g * g_g
        h_new = o_g * jnp.tanh(c_new)
        return h_new, c_new

    # ---- Layer 0: hoisted input projection (one well-shaped matmul) --------
    gx_sc[...] = jnp.dot(x_ref[...].astype(bf16), wih0_ref[...],
                         preferred_element_type=jnp.float32) + b0_ref[...]

    h = jnp.zeros((B, H), jnp.float32)
    c = jnp.zeros((B, H), jnp.float32)
    h0 = []
    for t in range(T):                       # fully unrolled
        # rows b*T + t  -> strided read, off the h-dependency chain
        gx_t = gx_sc[pl.ds(t, B, stride=T), :]
        gates = gx_t + jnp.dot(h.astype(bf16), whh0_ref[...],
                               preferred_element_type=jnp.float32)
        h, c = cell(gates, c)
        h0.append(h)

    # ---- Layers 1 & 2: per-step fused [h_prev, h_in] @ [W_hh; W_ih] --------
    # (no full-buffer barrier: step t consumes only the lower layer's step-t h)
    def run_upper_layer(h_in_list, wcat_ref, b_ref):
        hh = jnp.zeros((B, H), jnp.float32)
        cc = jnp.zeros((B, H), jnp.float32)
        outs = []
        for t in range(T):
            # h_prev first so the chain-critical operand needs no lane shift
            lhs = jnp.concatenate([hh, h_in_list[t]], axis=-1).astype(bf16)
            gates = jnp.dot(lhs, wcat_ref[...],
                            preferred_element_type=jnp.float32) + b_ref[...]
            hh, cc = cell(gates, cc)
            outs.append(hh)
        return outs

    h1 = run_upper_layer(h0, wcat1_ref, b1_ref)
    h2 = run_upper_layer(h1, wcat2_ref, b2_ref)

    # ---- FC head: Linear -> Tanh -> Linear -> Hardtanh -> Linear -> Softmax
    # In-register lane concat == out.contiguous().view(-1, T*H) for
    # batch_first LSTM output (t-major within each row).
    flat = jnp.concatenate(h2, axis=-1)                          # (B, T*H)
    a1 = jnp.tanh(jnp.dot(flat.astype(bf16), fc1w_ref[...],
                          preferred_element_type=jnp.float32) + fc1b_ref[...])
    a2 = jnp.clip(jnp.dot(a1.astype(bf16), fc2w_ref[...],
                          preferred_element_type=jnp.float32) + fc2b_ref[...],
                  -1.0, 1.0)                                     # Hardtanh
    logits = jnp.dot(a2.astype(bf16), fc3w_ref[...],
                     preferred_element_type=jnp.float32) + fc3b_ref[...]
    # Logits are bounded (|a2|<=1, small fc3 weights) -> skip the max-reduce.
    e = jnp.exp(logits)
    out_ref[...] = e / jnp.sum(e, axis=-1, keepdims=True)


# -------------------- wrapper -----------------------------------------------
def vanila_lstm_forward(prep, x):
    """x: (B, T, In) batch_first, like the PyTorch module. Returns (B, 3)."""
    B, T, In = x.shape
    H = HIDDEN_SIZE

    # Contiguous flatten only (row b*T + t) -- layout-free, unlike the old
    # transpose+reshape HBM round trip.
    x2d = x.reshape(B * T, In).astype(jnp.float32)

    l0, l1, l2 = prep["lstm"]
    args = [x2d,
            l0["w_ih"], l0["w_hh"], l0["bias"],
            l1["w_cat"], l1["bias"],
            l2["w_cat"], l2["bias"],
            *prep["fc1"], *prep["fc2"], *prep["fc3"]]

    vmem = pltpu.MemorySpace.VMEM
    kernel = functools.partial(_fused_lstm_fc_kernel,
                               seq_len=T, batch=B, hidden=H)
    return pl.pallas_call(
        kernel,
        out_shape=jax.ShapeDtypeStruct((B, NUM_CLASSES), jnp.float32),
        in_specs=[pl.BlockSpec(memory_space=vmem)] * len(args),
        out_specs=pl.BlockSpec(memory_space=vmem),
        scratch_shapes=[
            pltpu.VMEM((B * T, 4 * H), jnp.float32),   # hoisted layer-0 gates
        ],
    )(*args)


# -------------------- parameter init (raw, PyTorch layout) ------------------
def init_raw_params(key):
    raw = {"lstm": []}
    k_h = 1.0 / math.sqrt(HIDDEN_SIZE)
    for layer in range(NUM_LAYERS):
        in_dim = INPUT_SIZE if layer == 0 else HIDDEN_SIZE
        key, k1, k2, k3, k4 = jax.random.split(key, 5)
        raw["lstm"].append(dict(
            w_ih=jax.random.uniform(k1, (4 * HIDDEN_SIZE, in_dim),
                                    jnp.float32, -k_h, k_h),
            w_hh=jax.random.uniform(k2, (4 * HIDDEN_SIZE, HIDDEN_SIZE),
                                    jnp.float32, -k_h, k_h),
            b_ih=jax.random.uniform(k3, (4 * HIDDEN_SIZE,),
                                    jnp.float32, -k_h, k_h),
            b_hh=jax.random.uniform(k4, (4 * HIDDEN_SIZE,),
                                    jnp.float32, -k_h, k_h),
        ))

    def linear(key, in_f, out_f):
        k = 1.0 / math.sqrt(in_f)
        kw, kb = jax.random.split(key)
        w = jax.random.uniform(kw, (out_f, in_f), jnp.float32, -k, k)
        b = jax.random.uniform(kb, (out_f,), jnp.float32, -k, k)
        return w, b

    key, ka, kb, kc = jax.random.split(key, 4)
    raw["fc1"] = linear(ka, SEQ_LEN * HIDDEN_SIZE, HIDDEN_SIZE)
    raw["fc2"] = linear(kb, HIDDEN_SIZE, FC_MID)
    raw["fc3"] = linear(kc, FC_MID, NUM_CLASSES)
    return raw


# -------------------- kernel-ready parameter prep ---------------------------
def prepare_params(raw):
    """Transpose to (in,out), cast MXU operands to bf16, pre-sum LSTM biases,
    pre-scale i/f/o columns by 0.5 (single-tanh trick), and stack [W_hh; W_ih]
    for layers 1-2 (fused per-step matmul)."""
    H = HIDDEN_SIZE
    col_scale = jnp.concatenate([jnp.full((2 * H,), 0.5, jnp.float32),
                                 jnp.ones((H,), jnp.float32),
                                 jnp.full((H,), 0.5, jnp.float32)])
    prep = {"lstm": []}
    for li, layer in enumerate(raw["lstm"]):
        w_ih_t = layer["w_ih"].T * col_scale            # (in, 4H)
        w_hh_t = layer["w_hh"].T * col_scale            # (H, 4H)
        bias = ((layer["b_ih"] + layer["b_hh"]) * col_scale).reshape(1, 4 * H)
        if li == 0:
            prep["lstm"].append(dict(w_ih=w_ih_t.astype(jnp.bfloat16),
                                     w_hh=w_hh_t.astype(jnp.bfloat16),
                                     bias=bias.astype(jnp.float32)))
        else:
            # kernel LHS is [h_prev, h_in]  -> RHS rows are [W_hh ; W_ih]
            w_cat = jnp.concatenate([w_hh_t, w_ih_t], axis=0)   # (2H, 4H)
            prep["lstm"].append(dict(w_cat=w_cat.astype(jnp.bfloat16),
                                     bias=bias.astype(jnp.float32)))
    for name in ("fc1", "fc2", "fc3"):
        w, b = raw[name]
        prep[name] = (w.T.astype(jnp.bfloat16),
                      b.reshape(1, -1).astype(jnp.float32))
    return prep


# -------------------- pure-JAX reference (bf16 matmul operands) -------------
def reference_forward(raw, x):
    B, T, _ = x.shape
    H = HIDDEN_SIZE
    bf16 = jnp.bfloat16

    def mm(a, b):
        return jnp.dot(a.astype(bf16), b.astype(bf16),
                       preferred_element_type=jnp.float32)

    seq = x
    for layer in raw["lstm"]:
        w_ih_t, w_hh_t = layer["w_ih"].T, layer["w_hh"].T
        bias = layer["b_ih"] + layer["b_hh"]
        h = jnp.zeros((B, H), jnp.float32)
        c = jnp.zeros((B, H), jnp.float32)
        outs = []
        for t in range(T):
            z = mm(seq[:, t, :], w_ih_t) + mm(h, w_hh_t) + bias
            i = jax.nn.sigmoid(z[:, :H])
            f = jax.nn.sigmoid(z[:, H:2 * H])
            g = jnp.tanh(z[:, 2 * H:3 * H])
            o = jax.nn.sigmoid(z[:, 3 * H:])
            c = f * c + i * g
            h = o * jnp.tanh(c)
            outs.append(h)
        seq = jnp.stack(outs, axis=1)                    # (B, T, H)

    flat = seq.reshape(B, T * H)
    w1, b1 = raw["fc1"]
    w2, b2 = raw["fc2"]
    w3, b3 = raw["fc3"]
    a1 = jnp.tanh(mm(flat, w1.T) + b1)
    a2 = jnp.clip(mm(a1, w2.T) + b2, -1.0, 1.0)
    logits = mm(a2, w3.T) + b3
    return jax.nn.softmax(logits, axis=-1)


if __name__ == "__main__":
    key = jax.random.PRNGKey(0)
    key, pkey, xkey = jax.random.split(key, 3)
    raw = init_raw_params(pkey)
    prep = prepare_params(raw)
    x = jax.random.normal(xkey, (BATCH, SEQ_LEN, INPUT_SIZE), jnp.float32)

    fwd = jax.jit(vanila_lstm_forward)
    out = jax.block_until_ready(fwd(prep, x))

    assert out.shape == (BATCH, NUM_CLASSES), out.shape
    # softmax rows sum to 1
    assert jnp.allclose(jnp.sum(out, axis=-1), 1.0, atol=1e-5)
    # validate the bf16/single-tanh kernel against a pure-JAX reference that
    # uses the same bf16 MXU operand precision
    ref = reference_forward(raw, x)
    assert jnp.allclose(out, ref, atol=2e-3, rtol=2e-3), \
        float(jnp.max(jnp.abs(out - ref)))
    print("KERNEL_OK")
</pallas_src>

<mosaic_0001>
module attributes {stable_mosaic.version = 11 : i64} {
  func.func @_fused_lstm_fc_kernel(%arg0: memref<32x64xf32, #tpu.memory_space<vmem>>, %arg1: memref<64x128xbf16, #tpu.memory_space<vmem>>, %arg2: memref<32x128xbf16, #tpu.memory_space<vmem>>, %arg3: memref<1x128xf32, #tpu.memory_space<vmem>>, %arg4: memref<64x128xbf16, #tpu.memory_space<vmem>>, %arg5: memref<1x128xf32, #tpu.memory_space<vmem>>, %arg6: memref<64x128xbf16, #tpu.memory_space<vmem>>, %arg7: memref<1x128xf32, #tpu.memory_space<vmem>>, %arg8: memref<256x32xbf16, #tpu.memory_space<vmem>>, %arg9: memref<1x32xf32, #tpu.memory_space<vmem>>, %arg10: memref<32x32xbf16, #tpu.memory_space<vmem>>, %arg11: memref<1x32xf32, #tpu.memory_space<vmem>>, %arg12: memref<32x3xbf16, #tpu.memory_space<vmem>>, %arg13: memref<1x3xf32, #tpu.memory_space<vmem>>, %arg14: memref<4x3xf32, #tpu.memory_space<vmem>>, %arg15: memref<32x128xf32, #tpu.memory_space<vmem>>) attributes {dimension_semantics = [], scalar_prefetch = 0 : i64, scratch_operands = 1 : i64, tpu.core_type = #tpu.core_type<tc>} {
    %0 = tpu.iota {dimensions = array<i32: 1>} : vector<4x128xi32>
    %c64_i32 = arith.constant 64 : i32
    %1 = vector.broadcast %c64_i32 : i32 to vector<4x128xi32>
    %2 = arith.cmpi sge, %0, %1 : vector<4x128xi32>
    %c96_i32 = arith.constant 96 : i32
    %3 = vector.broadcast %c96_i32 : i32 to vector<4x128xi32>
    %4 = arith.cmpi slt, %0, %3 : vector<4x128xi32>
    %5 = arith.andi %2, %4 : vector<4x128xi1>
    %cst = arith.constant 1.000000e+00 : f32
    %cst_0 = arith.constant 5.000000e-01 : f32
    %6 = vector.broadcast %cst : f32 to vector<4x128xf32>
    %7 = vector.broadcast %cst_0 : f32 to vector<4x128xf32>
    %8 = arith.select %5, %6, %7 : vector<4x128xi1>, vector<4x128xf32>
    %cst_1 = arith.constant 0.000000e+00 : f32
    %cst_2 = arith.constant 5.000000e-01 : f32
    %9 = vector.broadcast %cst_1 : f32 to vector<4x128xf32>
    %10 = vector.broadcast %cst_2 : f32 to vector<4x128xf32>
    %11 = arith.select %5, %9, %10 : vector<4x128xi1>, vector<4x128xf32>
    %c0 = arith.constant 0 : index
    %c0_3 = arith.constant 0 : index
    %12 = vector.load %arg0[%c0, %c0_3] : memref<32x64xf32, #tpu.memory_space<vmem>>, vector<32x64xf32>
    %13 = arith.truncf %12 : vector<32x64xf32> to vector<32x64xbf16>
    %c0_4 = arith.constant 0 : index
    %c0_5 = arith.constant 0 : index
    %14 = vector.load %arg1[%c0_4, %c0_5] : memref<64x128xbf16, #tpu.memory_space<vmem>>, vector<64x128xbf16>
    %cst_6 = arith.constant dense<0.000000e+00> : vector<32x128xf32>
    %15 = tpu.matmul %13, %14, %cst_6 {dimension_numbers = #tpu.dot_dimension_numbers<[1], [0], [0], [1], [0, 0, 1, 1], [], []>} : vector<32x64xbf16>, vector<64x128xbf16>, vector<32x128xf32> -> vector<32x128xf32>
    %c0_7 = arith.constant 0 : index
    %c0_8 = arith.constant 0 : index
    %16 = vector.load %arg3[%c0_7, %c0_8] : memref<1x128xf32, #tpu.memory_space<vmem>>, vector<1x128xf32>
    %17 = vector.broadcast %16 : vector<1x128xf32> to vector<32x128xf32>
    %18 = arith.addf %15, %17 : vector<32x128xf32>
    %c0_9 = arith.constant 0 : index
    %c0_10 = arith.constant 0 : index
    %19 = vector.load %arg15[%c0_9, %c0_10] : memref<32x128xf32, #tpu.memory_space<vmem>>, vector<32x128xf32>
    tpu.vector_store %arg15[%c0_9, %c0_10], %18 {strides = array<i32>} : memref<32x128xf32, #tpu.memory_space<vmem>>, vector<32x128xf32>,
    %cst_11 = arith.constant 0.000000e+00 : f32
    %20 = vector.broadcast %cst_11 : f32 to vector<4x32xf32>
    %cst_12 = arith.constant 0.000000e+00 : f32
    %21 = vector.broadcast %cst_12 : f32 to vector<4x32xf32>
    %c0_13 = arith.constant 0 : index
    %c0_14 = arith.constant 0 : index
    %22 = tpu.strided_load %arg15[%c0_13, %c0_14] {strides = array<i32: 8, 1>} : memref<32x128xf32, #tpu.memory_space<vmem>>, vector<4x128xf32>
    %23 = arith.truncf %20 : vector<4x32xf32> to vector<4x32xbf16>
    %c0_15 = arith.constant 0 : index
    %c0_16 = arith.constant 0 : index
    %24 = vector.load %arg2[%c0_15, %c0_16] : memref<32x128xbf16, #tpu.memory_space<vmem>>, vector<32x128xbf16>
    %cst_17 = arith.constant dense<0.000000e+00> : vector<4x128xf32>
    %25 = tpu.matmul %23, %24, %cst_17 {dimension_numbers = #tpu.dot_dimension_numbers<[1], [0], [0], [1], [0, 0, 1, 1], [], []>} : vector<4x32xbf16>, vector<32x128xbf16>, vector<4x128xf32> -> vector<4x128xf32>
    %26 = arith.addf %22, %25 : vector<4x128xf32>
    %27 = math.tanh %26 : vector<4x128xf32>
    %28 = arith.mulf %27, %8 : vector<4x128xf32>
    %29 = arith.addf %28, %11 : vector<4x128xf32>
    %30 = vector.extract_strided_slice %29 {offsets = [0, 0], sizes = [4, 32], strides = [1, 1]} : vector<4x128xf32> to vector<4x32xf32>
    %31 = vector.extract_strided_slice %29 {offsets = [0, 32], sizes = [4, 32], strides = [1, 1]} : vector<4x128xf32> to vector<4x32xf32>
    %32 = vector.extract_strided_slice %29 {offsets = [0, 64], sizes = [4, 32], strides = [1, 1]} : vector<4x128xf32> to vector<4x32xf32>
    %33 = vector.extract_strided_slice %29 {offsets = [0, 96], sizes = [4, 32], strides = [1, 1]} : vector<4x128xf32> to vector<4x32xf32>
    %34 = arith.mulf %31, %21 : vector<4x32xf32>
    %35 = arith.mulf %30, %32 : vector<4x32xf32>
    %36 = arith.addf %34, %35 : vector<4x32xf32>
    %37 = math.tanh %36 : vector<4x32xf32>
    %38 = arith.mulf %33, %37 : vector<4x32xf32>
    %c1 = arith.constant 1 : index
    %c0_18 = arith.constant 0 : index
    %39 = tpu.strided_load %arg15[%c1, %c0_18] {strides = array<i32: 8, 1>} : memref<32x128xf32, #tpu.memory_space<vmem>>, vector<4x128xf32>
    %40 = arith.truncf %38 : vector<4x32xf32> to vector<4x32xbf16>
    %c0_19 = arith.constant 0 : index
    %c0_20 = arith.constant 0 : index
    %41 = vector.load %arg2[%c0_19, %c0_20] : memref<32x128xbf16, #tpu.memory_space<vmem>>, vector<32x128xbf16>
    %cst_21 = arith.constant dense<0.000000e+00> : vector<4x128xf32>
    %42 = tpu.matmul %40, %41, %cst_21 {dimension_numbers = #tpu.dot_dimension_numbers<[1], [0], [0], [1], [0, 0, 1, 1], [], []>} : vector<4x32xbf16>, vector<32x128xbf16>, vector<4x128xf32> -> vector<4x128xf32>
    %43 = arith.addf %39, %42 : vector<4x128xf32>
    %44 = math.tanh %43 : vector<4x128xf32>
    %45 = arith.mulf %44, %8 : vector<4x128xf32>
    %46 = arith.addf %45, %11 : vector<4x128xf32>
    %47 = vector.extract_strided_slice %46 {offsets = [0, 0], sizes = [4, 32], strides = [1, 1]} : vector<4x128xf32> to vector<4x32xf32>
    %48 = vector.extract_strided_slice %46 {offsets = [0, 32], sizes = [4, 32], strides = [1, 1]} : vector<4x128xf32> to vector<4x32xf32>
    %49 = vector.extract_strided_slice %46 {offsets = [0, 64], sizes = [4, 32], strides = [1, 1]} : vector<4x128xf32> to vector<4x32xf32>
    %50 = vector.extract_strided_slice %46 {offsets = [0, 96], sizes = [4, 32], strides = [1, 1]} : vector<4x128xf32> to vector<4x32xf32>
    %51 = arith.mulf %48, %36 : vector<4x32xf32>
    %52 = arith.mulf %47, %49 : vector<4x32xf32>
    %53 = arith.addf %51, %52 : vector<4x32xf32>
    %54 = math.tanh %53 : vector<4x32xf32>
    %55 = arith.mulf %50, %54 : vector<4x32xf32>
    %c2 = arith.constant 2 : index
    %c0_22 = arith.constant 0 : index
    %56 = tpu.strided_load %arg15[%c2, %c0_22] {strides = array<i32: 8, 1>} : memref<32x128xf32, #tpu.memory_space<vmem>>, vector<4x128xf32>
    %57 = arith.truncf %55 : vector<4x32xf32> to vector<4x32xbf16>
    %c0_23 = arith.constant 0 : index
    %c0_24 = arith.constant 0 : index
    %58 = vector.load %arg2[%c0_23, %c0_24] : memref<32x128xbf16, #tpu.memory_space<vmem>>, vector<32x128xbf16>
    %cst_25 = arith.constant dense<0.000000e+00> : vector<4x128xf32>
    %59 = tpu.matmul %57, %58, %cst_25 {dimension_numbers = #tpu.dot_dimension_numbers<[1], [0], [0], [1], [0, 0, 1, 1], [], []>} : vector<4x32xbf16>, vector<32x128xbf16>, vector<4x128xf32> -> vector<4x128xf32>
    %60 = arith.addf %56, %59 : vector<4x128xf32>
    %61 = math.tanh %60 : vector<4x128xf32>
    %62 = arith.mulf %61, %8 : vector<4x128xf32>
    %63 = arith.addf %62, %11 : vector<4x128xf32>
    %64 = vector.extract_strided_slice %63 {offsets = [0, 0], sizes = [4, 32], strides = [1, 1]} : vector<4x128xf32> to vector<4x32xf32>
    %65 = vector.extract_strided_slice %63 {offsets = [0, 32], sizes = [4, 32], strides = [1, 1]} : vector<4x128xf32> to vector<4x32xf32>
    %66 = vector.extract_strided_slice %63 {offsets = [0, 64], sizes = [4, 32], strides = [1, 1]} : vector<4x128xf32> to vector<4x32xf32>
    %67 = vector.extract_strided_slice %63 {offsets = [0, 96], sizes = [4, 32], strides = [1, 1]} : vector<4x128xf32> to vector<4x32xf32>
    %68 = arith.mulf %65, %53 : vector<4x32xf32>
    %69 = arith.mulf %64, %66 : vector<4x32xf32>
    %70 = arith.addf %68, %69 : vector<4x32xf32>
    %71 = math.tanh %70 : vector<4x32xf32>
    %72 = arith.mulf %67, %71 : vector<4x32xf32>
    %c3 = arith.constant 3 : index
    %c0_26 = arith.constant 0 : index
    %73 = tpu.strided_load %arg15[%c3, %c0_26] {strides = array<i32: 8, 1>} : memref<32x128xf32, #tpu.memory_space<vmem>>, vector<4x128xf32>
    %74 = arith.truncf %72 : vector<4x32xf32> to vector<4x32xbf16>
    %c0_27 = arith.constant 0 : index
    %c0_28 = arith.constant 0 : index
    %75 = vector.load %arg2[%c0_27, %c0_28] : memref<32x128xbf16, #tpu.memory_space<vmem>>, vector<32x128xbf16>
    %cst_29 = arith.constant dense<0.000000e+00> : vector<4x128xf32>
    %76 = tpu.matmul %74, %75, %cst_29 {dimension_numbers = #tpu.dot_dimension_numbers<[1], [0], [0], [1], [0, 0, 1, 1], [], []>} : vector<4x32xbf16>, vector<32x128xbf16>, vector<4x128xf32> -> vector<4x128xf32>
    %77 = arith.addf %73, %76 : vector<4x128xf32>
    %78 = math.tanh %77 : vector<4x128xf32>
    %79 = arith.mulf %78, %8 : vector<4x128xf32>
    %80 = arith.addf %79, %11 : vector<4x128xf32>
    %81 = vector.extract_strided_slice %80 {offsets = [0, 0], sizes = [4, 32], strides = [1, 1]} : vector<4x128xf32> to vector<4x32xf32>
    %82 = vector.extract_strided_slice %80 {offsets = [0, 32], sizes = [4, 32], strides = [1, 1]} : vector<4x128xf32> to vector<4x32xf32>
    %83 = vector.extract_strided_slice %80 {offsets = [0, 64], sizes = [4, 32], strides = [1, 1]} : vector<4x128xf32> to vector<4x32xf32>
    %84 = vector.extract_strided_slice %80 {offsets = [0, 96], sizes = [4, 32], strides = [1, 1]} : vector<4x128xf32> to vector<4x32xf32>
    %85 = arith.mulf %82, %70 : vector<4x32xf32>
    %86 = arith.mulf %81, %83 : vector<4x32xf32>
    %87 = arith.addf %85, %86 : vector<4x32xf32>
    %88 = math.tanh %87 : vector<4x32xf32>
    %89 = arith.mulf %84, %88 : vector<4x32xf32>
    %c4 = arith.constant 4 : index
    %c0_30 = arith.constant 0 : index
    %90 = tpu.strided_load %arg15[%c4, %c0_30] {strides = array<i32: 8, 1>} : memref<32x128xf32, #tpu.memory_space<vmem>>, vector<4x128xf32>
    %91 = arith.truncf %89 : vector<4x32xf32> to vector<4x32xbf16>
    %c0_31 = arith.constant 0 : index
    %c0_32 = arith.constant 0 : index
    %92 = vector.load %arg2[%c0_31, %c0_32] : memref<32x128xbf16, #tpu.memory_space<vmem>>, vector<32x128xbf16>
    %cst_33 = arith.constant dense<0.000000e+00> : vector<4x128xf32>
    %93 = tpu.matmul %91, %92, %cst_33 {dimension_numbers = #tpu.dot_dimension_numbers<[1], [0], [0], [1], [0, 0, 1, 1], [], []>} : vector<4x32xbf16>, vector<32x128xbf16>, vector<4x128xf32> -> vector<4x128xf32>
    %94 = arith.addf %90, %93 : vector<4x128xf32>
    %95 = math.tanh %94 : vector<4x128xf32>
    %96 = arith.mulf %95, %8 : vector<4x128xf32>
    %97 = arith.addf %96, %11 : vector<4x128xf32>
    %98 = vector.extract_strided_slice %97 {offsets = [0, 0], sizes = [4, 32], strides = [1, 1]} : vector<4x128xf32> to vector<4x32xf32>
    %99 = vector.extract_strided_slice %97 {offsets = [0, 32], sizes = [4, 32], strides = [1, 1]} : vector<4x128xf32> to vector<4x32xf32>
    %100 = vector.extract_strided_slice %97 {offsets = [0, 64], sizes = [4, 32], strides = [1, 1]} : vector<4x128xf32> to vector<4x32xf32>
    %101 = vector.extract_strided_slice %97 {offsets = [0, 96], sizes = [4, 32], strides = [1, 1]} : vector<4x128xf32> to vector<4x32xf32>
    %102 = arith.mulf %99, %87 : vector<4x32xf32>
    %103 = arith.mulf %98, %100 : vector<4x32xf32>
    %104 = arith.addf %102, %103 : vector<4x32xf32>
    %105 = math.tanh %104 : vector<4x32xf32>
    %106 = arith.mulf %101, %105 : vector<4x32xf32>
    %c5 = arith.constant 5 : index
    %c0_34 = arith.constant 0 : index
    %107 = tpu.strided_load %arg15[%c5, %c0_34] {strides = array<i32: 8, 1>} : memref<32x128xf32, #tpu.memory_space<vmem>>, vector<4x128xf32>
    %108 = arith.truncf %106 : vector<4x32xf32> to vector<4x32xbf16>
    %c0_35 = arith.constant 0 : index
    %c0_36 = arith.constant 0 : index
    %109 = vector.load %arg2[%c0_35, %c0_36] : memref<32x128xbf16, #tpu.memory_space<vmem>>, vector<32x128xbf16>
    %cst_37 = arith.constant dense<0.000000e+00> : vector<4x128xf32>
    %110 = tpu.matmul %108, %109, %cst_37 {dimension_numbers = #tpu.dot_dimension_numbers<[1], [0], [0], [1], [0, 0, 1, 1], [], []>} : vector<4x32xbf16>, vector<32x128xbf16>, vector<4x128xf32> -> vector<4x128xf32>
    %111 = arith.addf %107, %110 : vector<4x128xf32>
    %112 = math.tanh %111 : vector<4x128xf32>
    %113 = arith.mulf %112, %8 : vector<4x128xf32>
    %114 = arith.addf %113, %11 : vector<4x128xf32>
    %115 = vector.extract_strided_slice %114 {offsets = [0, 0], sizes = [4, 32], strides = [1, 1]} : vector<4x128xf32> to vector<4x32xf32>
    %116 = vector.extract_strided_slice %114 {offsets = [0, 32], sizes = [4, 32], strides = [1, 1]} : vector<4x128xf32> to vector<4x32xf32>
    %117 = vector.extract_strided_slice %114 {offsets = [0, 64], sizes = [4, 32], strides = [1, 1]} : vector<4x128xf32> to vector<4x32xf32>
    %118 = vector.extract_strided_slice %114 {offsets = [0, 96], sizes = [4, 32], strides = [1, 1]} : vector<4x128xf32> to vector<4x32xf32>
    %119 = arith.mulf %116, %104 : vector<4x32xf32>
    %120 = arith.mulf %115, %117 : vector<4x32xf32>
    %121 = arith.addf %119, %120 : vector<4x32xf32>
    %122 = math.tanh %121 : vector<4x32xf32>
    %123 = arith.mulf %118, %122 : vector<4x32xf32>
    %c6 = arith.constant 6 : index
    %c0_38 = arith.constant 0 : index
    %124 = tpu.strided_load %arg15[%c6, %c0_38] {strides = array<i32: 8, 1>} : memref<32x128xf32, #tpu.memory_space<vmem>>, vector<4x128xf32>
    %125 = arith.truncf %123 : vector<4x32xf32> to vector<4x32xbf16>
    %c0_39 = arith.constant 0 : index
    %c0_40 = arith.constant 0 : index
    %126 = vector.load %arg2[%c0_39, %c0_40] : memref<32x128xbf16, #tpu.memory_space<vmem>>, vector<32x128xbf16>
    %cst_41 = arith.constant dense<0.000000e+00> : vector<4x128xf32>
    %127 = tpu.matmul %125, %126, %cst_41 {dimension_numbers = #tpu.dot_dimension_numbers<[1], [0], [0], [1], [0, 0, 1, 1], [], []>} : vector<4x32xbf16>, vector<32x128xbf16>, vector<4x128xf32> -> vector<4x128xf32>
    %128 = arith.addf %124, %127 : vector<4x128xf32>
    %129 = math.tanh %128 : vector<4x128xf32>
    %130 = arith.mulf %129, %8 : vector<4x128xf32>
    %131 = arith.addf %130, %11 : vector<4x128xf32>
    %132 = vector.extract_strided_slice %131 {offsets = [0, 0], sizes = [4, 32], strides = [1, 1]} : vector<4x128xf32> to vector<4x32xf32>
    %133 = vector.extract_strided_slice %131 {offsets = [0, 32], sizes = [4, 32], strides = [1, 1]} : vector<4x128xf32> to vector<4x32xf32>
    %134 = vector.extract_strided_slice %131 {offsets = [0, 64], sizes = [4, 32], strides = [1, 1]} : vector<4x128xf32> to vector<4x32xf32>
    %135 = vector.extract_strided_slice %131 {offsets = [0, 96], sizes = [4, 32], strides = [1, 1]} : vector<4x128xf32> to vector<4x32xf32>
    %136 = arith.mulf %133, %121 : vector<4x32xf32>
    %137 = arith.mulf %132, %134 : vector<4x32xf32>
    %138 = arith.addf %136, %137 : vector<4x32xf32>
    %139 = math.tanh %138 : vector<4x32xf32>
    %140 = arith.mulf %135, %139 : vector<4x32xf32>
    %c7 = arith.constant 7 : index
    %c0_42 = arith.constant 0 : index
    %141 = tpu.strided_load %arg15[%c7, %c0_42] {strides = array<i32: 8, 1>} : memref<32x128xf32, #tpu.memory_space<vmem>>, vector<4x128xf32>
    %142 = arith.truncf %140 : vector<4x32xf32> to vector<4x32xbf16>
    %c0_43 = arith.constant 0 : index
    %c0_44 = arith.constant 0 : index
    %143 = vector.load %arg2[%c0_43, %c0_44] : memref<32x128xbf16, #tpu.memory_space<vmem>>, vector<32x128xbf16>
    %cst_45 = arith.constant dense<0.000000e+00> : vector<4x128xf32>
    %144 = tpu.matmul %142, %143, %cst_45 {dimension_numbers = #tpu.dot_dimension_numbers<[1], [0], [0], [1], [0, 0, 1, 1], [], []>} : vector<4x32xbf16>, vector<32x128xbf16>, vector<4x128xf32> -> vector<4x128xf32>
    %145 = arith.addf %141, %144 : vector<4x128xf32>
    %146 = math.tanh %145 : vector<4x128xf32>
    %147 = arith.mulf %146, %8 : vector<4x128xf32>
    %148 = arith.addf %147, %11 : vector<4x128xf32>
    %149 = vector.extract_strided_slice %148 {offsets = [0, 0], sizes = [4, 32], strides = [1, 1]} : vector<4x128xf32> to vector<4x32xf32>
    %150 = vector.extract_strided_slice %148 {offsets = [0, 32], sizes = [4, 32], strides = [1, 1]} : vector<4x128xf32> to vector<4x32xf32>
    %151 = vector.extract_strided_slice %148 {offsets = [0, 64], sizes = [4, 32], strides = [1, 1]} : vector<4x128xf32> to vector<4x32xf32>
    %152 = vector.extract_strided_slice %148 {offsets = [0, 96], sizes = [4, 32], strides = [1, 1]} : vector<4x128xf32> to vector<4x32xf32>
    %153 = arith.mulf %150, %138 : vector<4x32xf32>
    %154 = arith.mulf %149, %151 : vector<4x32xf32>
    %155 = arith.addf %153, %154 : vector<4x32xf32>
    %156 = math.tanh %155 : vector<4x32xf32>
    %157 = arith.mulf %152, %156 : vector<4x32xf32>
    %cst_46 = arith.constant 0.000000e+00 : f32
    %158 = vector.broadcast %cst_46 : f32 to vector<4x32xf32>
    %cst_47 = arith.constant 0.000000e+00 : f32
    %159 = vector.broadcast %cst_47 : f32 to vector<4x32xf32>
    %160 = tpu.concatenate %158, %38 in 1 : vector<4x32xf32>, vector<4x32xf32> -> vector<4x64xf32>
    %161 = arith.truncf %160 : vector<4x64xf32> to vector<4x64xbf16>
    %c0_48 = arith.constant 0 : index
    %c0_49 = arith.constant 0 : index
    %162 = vector.load %arg4[%c0_48, %c0_49] : memref<64x128xbf16, #tpu.memory_space<vmem>>, vector<64x128xbf16>
    %cst_50 = arith.constant dense<0.000000e+00> : vector<4x128xf32>
    %163 = tpu.matmul %161, %162, %cst_50 {dimension_numbers = #tpu.dot_dimension_numbers<[1], [0], [0], [1], [0, 0, 1, 1], [], []>} : vector<4x64xbf16>, vector<64x128xbf16>, vector<4x128xf32> -> vector<4x128xf32>
    %c0_51 = arith.constant 0 : index
    %c0_52 = arith.constant 0 : index
    %164 = vector.load %arg5[%c0_51, %c0_52] : memref<1x128xf32, #tpu.memory_space<vmem>>, vector<1x128xf32>
    %165 = vector.broadcast %164 : vector<1x128xf32> to vector<4x128xf32>
    %166 = arith.addf %163, %165 : vector<4x128xf32>
    %167 = math.tanh %166 : vector<4x128xf32>
    %168 = arith.mulf %167, %8 : vector<4x128xf32>
    %169 = arith.addf %168, %11 : vector<4x128xf32>
    %170 = vector.extract_strided_slice %169 {offsets = [0, 0], sizes = [4, 32], strides = [1, 1]} : vector<4x128xf32> to vector<4x32xf32>
    %171 = vector.extract_strided_slice %169 {offsets = [0, 32], sizes = [4, 32], strides = [1, 1]} : vector<4x128xf32> to vector<4x32xf32>
    %172 = vector.extract_strided_slice %169 {offsets = [0, 64], sizes = [4, 32], strides = [1, 1]} : vector<4x128xf32> to vector<4x32xf32>
    %173 = vector.extract_strided_slice %169 {offsets = [0, 96], sizes = [4, 32], strides = [1, 1]} : vector<4x128xf32> to vector<4x32xf32>
    %174 = arith.mulf %171, %159 : vector<4x32xf32>
    %175 = arith.mulf %170, %172 : vector<4x32xf32>
    %176 = arith.addf %174, %175 : vector<4x32xf32>
    %177 = math.tanh %176 : vector<4x32xf32>
    %178 = arith.mulf %173, %177 : vector<4x32xf32>
    %179 = tpu.concatenate %178, %55 in 1 : vector<4x32xf32>, vector<4x32xf32> -> vector<4x64xf32>
    %180 = arith.truncf %179 : vector<4x64xf32> to vector<4x64xbf16>
    %c0_53 = arith.constant 0 : index
    %c0_54 = arith.constant 0 : index
    %181 = vector.load %arg4[%c0_53, %c0_54] : memref<64x128xbf16, #tpu.memory_space<vmem>>, vector<64x128xbf16>
    %cst_55 = arith.constant dense<0.000000e+00> : vector<4x128xf32>
    %182 = tpu.matmul %180, %181, %cst_55 {dimension_numbers = #tpu.dot_dimension_numbers<[1], [0], [0], [1], [0, 0, 1, 1], [], []>} : vector<4x64xbf16>, vector<64x128xbf16>, vector<4x128xf32> -> vector<4x128xf32>
    %c0_56 = arith.constant 0 : index
    %c0_57 = arith.constant 0 : index
    %183 = vector.load %arg5[%c0_56, %c0_57] : memref<1x128xf32, #tpu.memory_space<vmem>>, vector<1x128xf32>
    %184 = vector.broadcast %183 : vector<1x128xf32> to vector<4x128xf32>
    %185 = arith.addf %182, %184 : vector<4x128xf32>
    %186 = math.tanh %185 : vector<4x128xf32>
    %187 = arith.mulf %186, %8 : vector<4x128xf32>
    %188 = arith.addf %187, %11 : vector<4x128xf32>
    %189 = vector.extract_strided_slice %188 {offsets = [0, 0], sizes = [4, 32], strides = [1, 1]} : vector<4x128xf32> to vector<4x32xf32>
    %190 = vector.extract_strided_slice %188 {offsets = [0, 32], sizes = [4, 32], strides = [1, 1]} : vector<4x128xf32> to vector<4x32xf32>
    %191 = vector.extract_strided_slice %188 {offsets = [0, 64], sizes = [4, 32], strides = [1, 1]} : vector<4x128xf32> to vector<4x32xf32>
    %192 = vector.extract_strided_slice %188 {offsets = [0, 96], sizes = [4, 32], strides = [1, 1]} : vector<4x128xf32> to vector<4x32xf32>
    %193 = arith.mulf %190, %176 : vector<4x32xf32>
    %194 = arith.mulf %189, %191 : vector<4x32xf32>
    %195 = arith.addf %193, %194 : vector<4x32xf32>
    %196 = math.tanh %195 : vector<4x32xf32>
    %197 = arith.mulf %192, %196 : vector<4x32xf32>
    %198 = tpu.concatenate %197, %72 in 1 : vector<4x32xf32>, vector<4x32xf32> -> vector<4x64xf32>
    %199 = arith.truncf %198 : vector<4x64xf32> to vector<4x64xbf16>
    %c0_58 = arith.constant 0 : index
    %c0_59 = arith.constant 0 : index
    %200 = vector.load %arg4[%c0_58, %c0_59] : memref<64x128xbf16, #tpu.memory_space<vmem>>, vector<64x128xbf16>
    %cst_60 = arith.constant dense<0.000000e+00> : vector<4x128xf32>
    %201 = tpu.matmul %199, %200, %cst_60 {dimension_numbers = #tpu.dot_dimension_numbers<[1], [0], [0], [1], [0, 0, 1, 1], [], []>} : vector<4x64xbf16>, vector<64x128xbf16>, vector<4x128xf32> -> vector<4x128xf32>
    %c0_61 = arith.constant 0 : index
    %c0_62 = arith.constant 0 : index
    %202 = vector.load %arg5[%c0_61, %c0_62] : memref<1x128xf32, #tpu.memory_space<vmem>>, vector<1x128xf32>
    %203 = vector.broadcast %202 : vector<1x128xf32> to vector<4x128xf32>
    %204 = arith.addf %201, %203 : vector<4x128xf32>
    %205 = math.tanh %204 : vector<4x128xf32>
    %206 = arith.mulf %205, %8 : vector<4x128xf32>
    %207 = arith.addf %206, %11 : vector<4x128xf32>
    %208 = vector.extract_strided_slice %207 {offsets = [0, 0], sizes = [4, 32], strides = [1, 1]} : vector<4x128xf32> to vector<4x32xf32>
    %209 = vector.extract_strided_slice %207 {offsets = [0, 32], sizes = [4, 32], strides = [1, 1]} : vector<4x128xf32> to vector<4x32xf32>
    %210 = vector.extract_strided_slice %207 {offsets = [0, 64], sizes = [4, 32], strides = [1, 1]} : vector<4x128xf32> to vector<4x32xf32>
    %211 = vector.extract_strided_slice %207 {offsets = [0, 96], sizes = [4, 32], strides = [1, 1]} : vector<4x128xf32> to vector<4x32xf32>
    %212 = arith.mulf %209, %195 : vector<4x32xf32>
    %213 = arith.mulf %208, %210 : vector<4x32xf32>
    %214 = arith.addf %212, %213 : vector<4x32xf32>
    %215 = math.tanh %214 : vector<4x32xf32>
    %216 = arith.mulf %211, %215 : vector<4x32xf32>
    %217 = tpu.concatenate %216, %89 in 1 : vector<4x32xf32>, vector<4x32xf32> -> vector<4x64xf32>
    %218 = arith.truncf %217 : vector<4x64xf32> to vector<4x64xbf16>
    %c0_63 = arith.constant 0 : index
    %c0_64 = arith.constant 0 : index
    %219 = vector.load %arg4[%c0_63, %c0_64] : memref<64x128xbf16, #tpu.memory_space<vmem>>, vector<64x128xbf16>
    %cst_65 = arith.constant dense<0.000000e+00> : vector<4x128xf32>
    %220 = tpu.matmul %218, %219, %cst_65 {dimension_numbers = #tpu.dot_dimension_numbers<[1], [0], [0], [1], [0, 0, 1, 1], [], []>} : vector<4x64xbf16>, vector<64x128xbf16>, vector<4x128xf32> -> vector<4x128xf32>
    %c0_66 = arith.constant 0 : index
    %c0_67 = arith.constant 0 : index
    %221 = vector.load %arg5[%c0_66, %c0_67] : memref<1x128xf32, #tpu.memory_space<vmem>>, vector<1x128xf32>
    %222 = vector.broadcast %221 : vector<1x128xf32> to vector<4x128xf32>
    %223 = arith.addf %220, %222 : vector<4x128xf32>
    %224 = math.tanh %223 : vector<4x128xf32>
    %225 = arith.mulf %224, %8 : vector<4x128xf32>
    %226 = arith.addf %225, %11 : vector<4x128xf32>
    %227 = vector.extract_strided_slice %226 {offsets = [0, 0], sizes = [4, 32], strides = [1, 1]} : vector<4x128xf32> to vector<4x32xf32>
    %228 = vector.extract_strided_slice %226 {offsets = [0, 32], sizes = [4, 32], strides = [1, 1]} : vector<4x128xf32> to vector<4x32xf32>
    %229 = vector.extract_strided_slice %226 {offsets = [0, 64], sizes = [4, 32], strides = [1, 1]} : vector<4x128xf32> to vector<4x32xf32>
    %230 = vector.extract_strided_slice %226 {offsets = [0, 96], sizes = [4, 32], strides = [1, 1]} : vector<4x128xf32> to vector<4x32xf32>
    %231 = arith.mulf %228, %214 : vector<4x32xf32>
    %232 = arith.mulf %227, %229 : vector<4x32xf32>
    %233 = arith.addf %231, %232 : vector<4x32xf32>
    %234 = math.tanh %233 : vector<4x32xf32>
    %235 = arith.mulf %230, %234 : vector<4x32xf32>
    %236 = tpu.concatenate %235, %106 in 1 : vector<4x32xf32>, vector<4x32xf32> -> vector<4x64xf32>
    %237 = arith.truncf %236 : vector<4x64xf32> to vector<4x64xbf16>
    %c0_68 = arith.constant 0 : index
    %c0_69 = arith.constant 0 : index
    %238 = vector.load %arg4[%c0_68, %c0_69] : memref<64x128xbf16, #tpu.memory_space<vmem>>, vector<64x128xbf16>
    %cst_70 = arith.constant dense<0.000000e+00> : vector<4x128xf32>
    %239 = tpu.matmul %237, %238, %cst_70 {dimension_numbers = #tpu.dot_dimension_numbers<[1], [0], [0], [1], [0, 0, 1, 1], [], []>} : vector<4x64xbf16>, vector<64x128xbf16>, vector<4x128xf32> -> vector<4x128xf32>
    %c0_71 = arith.constant 0 : index
    %c0_72 = arith.constant 0 : index
    %240 = vector.load %arg5[%c0_71, %c0_72] : memref<1x128xf32, #tpu.memory_space<vmem>>, vector<1x128xf32>
    %241 = vector.broadcast %240 : vector<1x128xf32> to vector<4x128xf32>
    %242 = arith.addf %239, %241 : vector<4x128xf32>
    %243 = math.tanh %242 : vector<4x128xf32>
    %244 = arith.mulf %243, %8 : vector<4x128xf32>
    %245 = arith.addf %244, %11 : vector<4x128xf32>
    %246 = vector.extract_strided_slice %245 {offsets = [0, 0], sizes = [4, 32], strides = [1, 1]} : vector<4x128xf32> to vector<4x32xf32>
    %247 = vector.extract_strided_slice %245 {offsets = [0, 32], sizes = [4, 32], strides = [1, 1]} : vector<4x128xf32> to vector<4x32xf32>
    %248 = vector.extract_strided_slice %245 {offsets = [0, 64], sizes = [4, 32], strides = [1, 1]} : vector<4x128xf32> to vector<4x32xf32>
    %249 = vector.extract_strided_slice %245 {offsets = [0, 96], sizes = [4, 32], strides = [1, 1]} : vector<4x128xf32> to vector<4x32xf32>
    %250 = arith.mulf %247, %233 : vector<4x32xf32>
    %251 = arith.mulf %246, %248 : vector<4x32xf32>
    %252 = arith.addf %250, %251 : vector<4x32xf32>
    %253 = math.tanh %252 : vector<4x32xf32>
    %254 = arith.mulf %249, %253 : vector<4x32xf32>
    %255 = tpu.concatenate %254, %123 in 1 : vector<4x32xf32>, vector<4x32xf32> -> vector<4x64xf32>
    %256 = arith.truncf %255 : vector<4x64xf32> to vector<4x64xbf16>
    %c0_73 = arith.constant 0 : index
    %c0_74 = arith.constant 0 : index
    %257 = vector.load %arg4[%c0_73, %c0_74] : memref<64x128xbf16, #tpu.memory_space<vmem>>, vector<64x128xbf16>
    %cst_75 = arith.constant dense<0.000000e+00> : vector<4x128xf32>
    %258 = tpu.matmul %256, %257, %cst_75 {dimension_numbers = #tpu.dot_dimension_numbers<[1], [0], [0], [1], [0, 0, 1, 1], [], []>} : vector<4x64xbf16>, vector<64x128xbf16>, vector<4x128xf32> -> vector<4x128xf32>
    %c0_76 = arith.constant 0 : index
    %c0_77 = arith.constant 0 : index
    %259 = vector.load %arg5[%c0_76, %c0_77] : memref<1x128xf32, #tpu.memory_space<vmem>>, vector<1x128xf32>
    %260 = vector.broadcast %259 : vector<1x128xf32> to vector<4x128xf32>
    %261 = arith.addf %258, %260 : vector<4x128xf32>
    %262 = math.tanh %261 : vector<4x128xf32>
    %263 = arith.mulf %262, %8 : vector<4x128xf32>
    %264 = arith.addf %263, %11 : vector<4x128xf32>
    %265 = vector.extract_strided_slice %264 {offsets = [0, 0], sizes = [4, 32], strides = [1, 1]} : vector<4x128xf32> to vector<4x32xf32>
    %266 = vector.extract_strided_slice %264 {offsets = [0, 32], sizes = [4, 32], strides = [1, 1]} : vector<4x128xf32> to vector<4x32xf32>
    %267 = vector.extract_strided_slice %264 {offsets = [0, 64], sizes = [4, 32], strides = [1, 1]} : vector<4x128xf32> to vector<4x32xf32>
    %268 = vector.extract_strided_slice %264 {offsets = [0, 96], sizes = [4, 32], strides = [1, 1]} : vector<4x128xf32> to vector<4x32xf32>
    %269 = arith.mulf %266, %252 : vector<4x32xf32>
    %270 = arith.mulf %265, %267 : vector<4x32xf32>
    %271 = arith.addf %269, %270 : vector<4x32xf32>
    %272 = math.tanh %271 : vector<4x32xf32>
    %273 = arith.mulf %268, %272 : vector<4x32xf32>
    %274 = tpu.concatenate %273, %140 in 1 : vector<4x32xf32>, vector<4x32xf32> -> vector<4x64xf32>
    %275 = arith.truncf %274 : vector<4x64xf32> to vector<4x64xbf16>
    %c0_78 = arith.constant 0 : index
    %c0_79 = arith.constant 0 : index
    %276 = vector.load %arg4[%c0_78, %c0_79] : memref<64x128xbf16, #tpu.memory_space<vmem>>, vector<64x128xbf16>
    %cst_80 = arith.constant dense<0.000000e+00> : vector<4x128xf32>
    %277 = tpu.matmul %275, %276, %cst_80 {dimension_numbers = #tpu.dot_dimension_numbers<[1], [0], [0], [1], [0, 0, 1, 1], [], []>} : vector<4x64xbf16>, vector<64x128xbf16>, vector<4x128xf32> -> vector<4x128xf32>
    %c0_81 = arith.constant 0 : index
    %c0_82 = arith.constant 0 : index
    %278 = vector.load %arg5[%c0_81, %c0_82] : memref<1x128xf32, #tpu.memory_space<vmem>>, vector<1x128xf32>
    %279 = vector.broadcast %278 : vector<1x128xf32> to vector<4x128xf32>
    %280 = arith.addf %277, %279 : vector<4x128xf32>
    %281 = math.tanh %280 : vector<4x128xf32>
    %282 = arith.mulf %281, %8 : vector<4x128xf32>
    %283 = arith.addf %282, %11 : vector<4x128xf32>
    %284 = vector.extract_strided_slice %283 {offsets = [0, 0], sizes = [4, 32], strides = [1, 1]} : vector<4x128xf32> to vector<4x32xf32>
    %285 = vector.extract_strided_slice %283 {offsets = [0, 32], sizes = [4, 32], strides = [1, 1]} : vector<4x128xf32> to vector<4x32xf32>
    %286 = vector.extract_strided_slice %283 {offsets = [0, 64], sizes = [4, 32], strides = [1, 1]} : vector<4x128xf32> to vector<4x32xf32>
    %287 = vector.extract_strided_slice %283 {offsets = [0, 96], sizes = [4, 32], strides = [1, 1]} : vector<4x128xf32> to vector<4x32xf32>
    %288 = arith.mulf %285, %271 : vector<4x32xf32>
    %289 = arith.mulf %284, %286 : vector<4x32xf32>
    %290 = arith.addf %288, %289 : vector<4x32xf32>
    %291 = math.tanh %290 : vector<4x32xf32>
    %292 = arith.mulf %287, %291 : vector<4x32xf32>
    %293 = tpu.concatenate %292, %157 in 1 : vector<4x32xf32>, vector<4x32xf32> -> vector<4x64xf32>
    %294 = arith.truncf %293 : vector<4x64xf32> to vector<4x64xbf16>
    %c0_83 = arith.constant 0 : index
    %c0_84 = arith.constant 0 : index
    %295 = vector.load %arg4[%c0_83, %c0_84] : memref<64x128xbf16, #tpu.memory_space<vmem>>, vector<64x128xbf16>
    %cst_85 = arith.constant dense<0.000000e+00> : vector<4x128xf32>
    %296 = tpu.matmul %294, %295, %cst_85 {dimension_numbers = #tpu.dot_dimension_numbers<[1], [0], [0], [1], [0, 0, 1, 1], [], []>} : vector<4x64xbf16>, vector<64x128xbf16>, vector<4x128xf32> -> vector<4x128xf32>
    %c0_86 = arith.constant 0 : index
    %c0_87 = arith.constant 0 : index
    %297 = vector.load %arg5[%c0_86, %c0_87] : memref<1x128xf32, #tpu.memory_space<vmem>>, vector<1x128xf32>
    %298 = vector.broadcast %297 : vector<1x128xf32> to vector<4x128xf32>
    %299 = arith.addf %296, %298 : vector<4x128xf32>
    %300 = math.tanh %299 : vector<4x128xf32>
    %301 = arith.mulf %300, %8 : vector<4x128xf32>
    %302 = arith.addf %301, %11 : vector<4x128xf32>
    %303 = vector.extract_strided_slice %302 {offsets = [0, 0], sizes = [4, 32], strides = [1, 1]} : vector<4x128xf32> to vector<4x32xf32>
    %304 = vector.extract_strided_slice %302 {offsets = [0, 32], sizes = [4, 32], strides = [1, 1]} : vector<4x128xf32> to vector<4x32xf32>
    %305 = vector.extract_strided_slice %302 {offsets = [0, 64], sizes = [4, 32], strides = [1, 1]} : vector<4x128xf32> to vector<4x32xf32>
    %306 = vector.extract_strided_slice %302 {offsets = [0, 96], sizes = [4, 32], strides = [1, 1]} : vector<4x128xf32> to vector<4x32xf32>
    %307 = arith.mulf %304, %290 : vector<4x32xf32>
    %308 = arith.mulf %303, %305 : vector<4x32xf32>
    %309 = arith.addf %307, %308 : vector<4x32xf32>
    %310 = math.tanh %309 : vector<4x32xf32>
    %311 = arith.mulf %306, %310 : vector<4x32xf32>
    %cst_88 = arith.constant 0.000000e+00 : f32
    %312 = vector.broadcast %cst_88 : f32 to vector<4x32xf32>
    %cst_89 = arith.constant 0.000000e+00 : f32
    %313 = vector.broadcast %cst_89 : f32 to vector<4x32xf32>
    %314 = tpu.concatenate %312, %178 in 1 : vector<4x32xf32>, vector<4x32xf32> -> vector<4x64xf32>
    %315 = arith.truncf %314 : vector<4x64xf32> to vector<4x64xbf16>
    %c0_90 = arith.constant 0 : index
    %c0_91 = arith.constant 0 : index
    %316 = vector.load %arg6[%c0_90, %c0_91] : memref<64x128xbf16, #tpu.memory_space<vmem>>, vector<64x128xbf16>
    %cst_92 = arith.constant dense<0.000000e+00> : vector<4x128xf32>
    %317 = tpu.matmul %315, %316, %cst_92 {dimension_numbers = #tpu.dot_dimension_numbers<[1], [0], [0], [1], [0, 0, 1, 1], [], []>} : vector<4x64xbf16>, vector<64x128xbf16>, vector<4x128xf32> -> vector<4x128xf32>
    %c0_93 = arith.constant 0 : index
    %c0_94 = arith.constant 0 : index
    %318 = vector.load %arg7[%c0_93, %c0_94] : memref<1x128xf32, #tpu.memory_space<vmem>>, vector<1x128xf32>
    %319 = vector.broadcast %318 : vector<1x128xf32> to vector<4x128xf32>
    %320 = arith.addf %317, %319 : vector<4x128xf32>
    %321 = math.tanh %320 : vector<4x128xf32>
    %322 = arith.mulf %321, %8 : vector<4x128xf32>
    %323 = arith.addf %322, %11 : vector<4x128xf32>
    %324 = vector.extract_strided_slice %323 {offsets = [0, 0], sizes = [4, 32], strides = [1, 1]} : vector<4x128xf32> to vector<4x32xf32>
    %325 = vector.extract_strided_slice %323 {offsets = [0, 32], sizes = [4, 32], strides = [1, 1]} : vector<4x128xf32> to vector<4x32xf32>
    %326 = vector.extract_strided_slice %323 {offsets = [0, 64], sizes = [4, 32], strides = [1, 1]} : vector<4x128xf32> to vector<4x32xf32>
    %327 = vector.extract_strided_slice %323 {offsets = [0, 96], sizes = [4, 32], strides = [1, 1]} : vector<4x128xf32> to vector<4x32xf32>
    %328 = arith.mulf %325, %313 : vector<4x32xf32>
    %329 = arith.mulf %324, %326 : vector<4x32xf32>
    %330 = arith.addf %328, %329 : vector<4x32xf32>
    %331 = math.tanh %330 : vector<4x32xf32>
    %332 = arith.mulf %327, %331 : vector<4x32xf32>
    %333 = tpu.concatenate %332, %197 in 1 : vector<4x32xf32>, vector<4x32xf32> -> vector<4x64xf32>
    %334 = arith.truncf %333 : vector<4x64xf32> to vector<4x64xbf16>
    %c0_95 = arith.constant 0 : index
    %c0_96 = arith.constant 0 : index
    %335 = vector.load %arg6[%c0_95, %c0_96] : memref<64x128xbf16, #tpu.memory_space<vmem>>, vector<64x128xbf16>
    %cst_97 = arith.constant dense<0.000000e+00> : vector<4x128xf32>
    %336 = tpu.matmul %334, %335, %cst_97 {dimension_numbers = #tpu.dot_dimension_numbers<[1], [0], [0], [1], [0, 0, 1, 1], [], []>} : vector<4x64xbf16>, vector<64x128xbf16>, vector<4x128xf32> -> vector<4x128xf32>
    %c0_98 = arith.constant 0 : index
    %c0_99 = arith.constant 0 : index
    %337 = vector.load %arg7[%c0_98, %c0_99] : memref<1x128xf32, #tpu.memory_space<vmem>>, vector<1x128xf32>
    %338 = vector.broadcast %337 : vector<1x128xf32> to vector<4x128xf32>
    %339 = arith.addf %336, %338 : vector<4x128xf32>
    %340 = math.tanh %339 : vector<4x128xf32>
    %341 = arith.mulf %340, %8 : vector<4x128xf32>
    %342 = arith.addf %341, %11 : vector<4x128xf32>
    %343 = vector.extract_strided_slice %342 {offsets = [0, 0], sizes = [4, 32], strides = [1, 1]} : vector<4x128xf32> to vector<4x32xf32>
    %344 = vector.extract_strided_slice %342 {offsets = [0, 32], sizes = [4, 32], strides = [1, 1]} : vector<4x128xf32> to vector<4x32xf32>
    %345 = vector.extract_strided_slice %342 {offsets = [0, 64], sizes = [4, 32], strides = [1, 1]} : vector<4x128xf32> to vector<4x32xf32>
    %346 = vector.extract_strided_slice %342 {offsets = [0, 96], sizes = [4, 32], strides = [1, 1]} : vector<4x128xf32> to vector<4x32xf32>
    %347 = arith.mulf %344, %330 : vector<4x32xf32>
    %348 = arith.mulf %343, %345 : vector<4x32xf32>
    %349 = arith.addf %347, %348 : vector<4x32xf32>
    %350 = math.tanh %349 : vector<4x32xf32>
    %351 = arith.mulf %346, %350 : vector<4x32xf32>
    %352 = tpu.concatenate %351, %216 in 1 : vector<4x32xf32>, vector<4x32xf32> -> vector<4x64xf32>
    %353 = arith.truncf %352 : vector<4x64xf32> to vector<4x64xbf16>
    %c0_100 = arith.constant 0 : index
    %c0_101 = arith.constant 0 : index
    %354 = vector.load %arg6[%c0_100, %c0_101] : memref<64x128xbf16, #tpu.memory_space<vmem>>, vector<64x128xbf16>
    %cst_102 = arith.constant dense<0.000000e+00> : vector<4x128xf32>
    %355 = tpu.matmul %353, %354, %cst_102 {dimension_numbers = #tpu.dot_dimension_numbers<[1], [0], [0], [1], [0, 0, 1, 1], [], []>} : vector<4x64xbf16>, vector<64x128xbf16>, vector<4x128xf32> -> vector<4x128xf32>
    %c0_103 = arith.constant 0 : index
    %c0_104 = arith.constant 0 : index
    %356 = vector.load %arg7[%c0_103, %c0_104] : memref<1x128xf32, #tpu.memory_space<vmem>>, vector<1x128xf32>
    %357 = vector.broadcast %356 : vector<1x128xf32> to vector<4x128xf32>
    %358 = arith.addf %355, %357 : vector<4x128xf32>
    %359 = math.tanh %358 : vector<4x128xf32>
    %360 = arith.mulf %359, %8 : vector<4x128xf32>
    %361 = arith.addf %360, %11 : vector<4x128xf32>
    %362 = vector.extract_strided_slice %361 {offsets = [0, 0], sizes = [4, 32], strides = [1, 1]} : vector<4x128xf32> to vector<4x32xf32>
    %363 = vector.extract_strided_slice %361 {offsets = [0, 32], sizes = [4, 32], strides = [1, 1]} : vector<4x128xf32> to vector<4x32xf32>
    %364 = vector.extract_strided_slice %361 {offsets = [0, 64], sizes = [4, 32], strides = [1, 1]} : vector<4x128xf32> to vector<4x32xf32>
    %365 = vector.extract_strided_slice %361 {offsets = [0, 96], sizes = [4, 32], strides = [1, 1]} : vector<4x128xf32> to vector<4x32xf32>
    %366 = arith.mulf %363, %349 : vector<4x32xf32>
    %367 = arith.mulf %362, %364 : vector<4x32xf32>
    %368 = arith.addf %366, %367 : vector<4x32xf32>
    %369 = math.tanh %368 : vector<4x32xf32>
    %370 = arith.mulf %365, %369 : vector<4x32xf32>
    %371 = tpu.concatenate %370, %235 in 1 : vector<4x32xf32>, vector<4x32xf32> -> vector<4x64xf32>
    %372 = arith.truncf %371 : vector<4x64xf32> to vector<4x64xbf16>
    %c0_105 = arith.constant 0 : index
    %c0_106 = arith.constant 0 : index
    %373 = vector.load %arg6[%c0_105, %c0_106] : memref<64x128xbf16, #tpu.memory_space<vmem>>, vector<64x128xbf16>
    %cst_107 = arith.constant dense<0.000000e+00> : vector<4x128xf32>
    %374 = tpu.matmul %372, %373, %cst_107 {dimension_numbers = #tpu.dot_dimension_numbers<[1], [0], [0], [1], [0, 0, 1, 1], [], []>} : vector<4x64xbf16>, vector<64x128xbf16>, vector<4x128xf32> -> vector<4x128xf32>
    %c0_108 = arith.constant 0 : index
    %c0_109 = arith.constant 0 : index
    %375 = vector.load %arg7[%c0_108, %c0_109] : memref<1x128xf32, #tpu.memory_space<vmem>>, vector<1x128xf32>
    %376 = vector.broadcast %375 : vector<1x128xf32> to vector<4x128xf32>
    %377 = arith.addf %374, %376 : vector<4x128xf32>
    %378 = math.tanh %377 : vector<4x128xf32>
    %379 = arith.mulf %378, %8 : vector<4x128xf32>
    %380 = arith.addf %379, %11 : vector<4x128xf32>
    %381 = vector.extract_strided_slice %380 {offsets = [0, 0], sizes = [4, 32], strides = [1, 1]} : vector<4x128xf32> to vector<4x32xf32>
    %382 = vector.extract_strided_slice %380 {offsets = [0, 32], sizes = [4, 32], strides = [1, 1]} : vector<4x128xf32> to vector<4x32xf32>
    %383 = vector.extract_strided_slice %380 {offsets = [0, 64], sizes = [4, 32], strides = [1, 1]} : vector<4x128xf32> to vector<4x32xf32>
    %384 = vector.extract_strided_slice %380 {offsets = [0, 96], sizes = [4, 32], strides = [1, 1]} : vector<4x128xf32> to vector<4x32xf32>
    %385 = arith.mulf %382, %368 : vector<4x32xf32>
    %386 = arith.mulf %381, %383 : vector<4x32xf32>
    %387 = arith.addf %385, %386 : vector<4x32xf32>
    %388 = math.tanh %387 : vector<4x32xf32>
    %389 = arith.mulf %384, %388 : vector<4x32xf32>
    %390 = tpu.concatenate %389, %254 in 1 : vector<4x32xf32>, vector<4x32xf32> -> vector<4x64xf32>
    %391 = arith.truncf %390 : vector<4x64xf32> to vector<4x64xbf16>
    %c0_110 = arith.constant 0 : index
    %c0_111 = arith.constant 0 : index
    %392 = vector.load %arg6[%c0_110, %c0_111] : memref<64x128xbf16, #tpu.memory_space<vmem>>, vector<64x128xbf16>
    %cst_112 = arith.constant dense<0.000000e+00> : vector<4x128xf32>
    %393 = tpu.matmul %391, %392, %cst_112 {dimension_numbers = #tpu.dot_dimension_numbers<[1], [0], [0], [1], [0, 0, 1, 1], [], []>} : vector<4x64xbf16>, vector<64x128xbf16>, vector<4x128xf32> -> vector<4x128xf32>
    %c0_113 = arith.constant 0 : index
    %c0_114 = arith.constant 0 : index
    %394 = vector.load %arg7[%c0_113, %c0_114] : memref<1x128xf32, #tpu.memory_space<vmem>>, vector<1x128xf32>
    %395 = vector.broadcast %394 : vector<1x128xf32> to vector<4x128xf32>
    %396 = arith.addf %393, %395 : vector<4x128xf32>
    %397 = math.tanh %396 : vector<4x128xf32>
    %398 = arith.mulf %397, %8 : vector<4x128xf32>
    %399 = arith.addf %398, %11 : vector<4x128xf32>
    %400 = vector.extract_strided_slice %399 {offsets = [0, 0], sizes = [4, 32], strides = [1, 1]} : vector<4x128xf32> to vector<4x32xf32>
    %401 = vector.extract_strided_slice %399 {offsets = [0, 32], sizes = [4, 32], strides = [1, 1]} : vector<4x128xf32> to vector<4x32xf32>
    %402 = vector.extract_strided_slice %399 {offsets = [0, 64], sizes = [4, 32], strides = [1, 1]} : vector<4x128xf32> to vector<4x32xf32>
    %403 = vector.extract_strided_slice %399 {offsets = [0, 96], sizes = [4, 32], strides = [1, 1]} : vector<4x128xf32> to vector<4x32xf32>
    %404 = arith.mulf %401, %387 : vector<4x32xf32>
    %405 = arith.mulf %400, %402 : vector<4x32xf32>
    %406 = arith.addf %404, %405 : vector<4x32xf32>
    %407 = math.tanh %406 : vector<4x32xf32>
    %408 = arith.mulf %403, %407 : vector<4x32xf32>
    %409 = tpu.concatenate %408, %273 in 1 : vector<4x32xf32>, vector<4x32xf32> -> vector<4x64xf32>
    %410 = arith.truncf %409 : vector<4x64xf32> to vector<4x64xbf16>
    %c0_115 = arith.constant 0 : index
    %c0_116 = arith.constant 0 : index
    %411 = vector.load %arg6[%c0_115, %c0_116] : memref<64x128xbf16, #tpu.memory_space<vmem>>, vector<64x128xbf16>
    %cst_117 = arith.constant dense<0.000000e+00> : vector<4x128xf32>
    %412 = tpu.matmul %410, %411, %cst_117 {dimension_numbers = #tpu.dot_dimension_numbers<[1], [0], [0], [1], [0, 0, 1, 1], [], []>} : vector<4x64xbf16>, vector<64x128xbf16>, vector<4x128xf32> -> vector<4x128xf32>
    %c0_118 = arith.constant 0 : index
    %c0_119 = arith.constant 0 : index
    %413 = vector.load %arg7[%c0_118, %c0_119] : memref<1x128xf32, #tpu.memory_space<vmem>>, vector<1x128xf32>
    %414 = vector.broadcast %413 : vector<1x128xf32> to vector<4x128xf32>
    %415 = arith.addf %412, %414 : vector<4x128xf32>
    %416 = math.tanh %415 : vector<4x128xf32>
    %417 = arith.mulf %416, %8 : vector<4x128xf32>
    %418 = arith.addf %417, %11 : vector<4x128xf32>
    %419 = vector.extract_strided_slice %418 {offsets = [0, 0], sizes = [4, 32], strides = [1, 1]} : vector<4x128xf32> to vector<4x32xf32>
    %420 = vector.extract_strided_slice %418 {offsets = [0, 32], sizes = [4, 32], strides = [1, 1]} : vector<4x128xf32> to vector<4x32xf32>
    %421 = vector.extract_strided_slice %418 {offsets = [0, 64], sizes = [4, 32], strides = [1, 1]} : vector<4x128xf32> to vector<4x32xf32>
    %422 = vector.extract_strided_slice %418 {offsets = [0, 96], sizes = [4, 32], strides = [1, 1]} : vector<4x128xf32> to vector<4x32xf32>
    %423 = arith.mulf %420, %406 : vector<4x32xf32>
    %424 = arith.mulf %419, %421 : vector<4x32xf32>
    %425 = arith.addf %423, %424 : vector<4x32xf32>
    %426 = math.tanh %425 : vector<4x32xf32>
    %427 = arith.mulf %422, %426 : vector<4x32xf32>
    %428 = tpu.concatenate %427, %292 in 1 : vector<4x32xf32>, vector<4x32xf32> -> vector<4x64xf32>
    %429 = arith.truncf %428 : vector<4x64xf32> to vector<4x64xbf16>
    %c0_120 = arith.constant 0 : index
    %c0_121 = arith.constant 0 : index
    %430 = vector.load %arg6[%c0_120, %c0_121] : memref<64x128xbf16, #tpu.memory_space<vmem>>, vector<64x128xbf16>
    %cst_122 = arith.constant dense<0.000000e+00> : vector<4x128xf32>
    %431 = tpu.matmul %429, %430, %cst_122 {dimension_numbers = #tpu.dot_dimension_numbers<[1], [0], [0], [1], [0, 0, 1, 1], [], []>} : vector<4x64xbf16>, vector<64x128xbf16>, vector<4x128xf32> -> vector<4x128xf32>
    %c0_123 = arith.constant 0 : index
    %c0_124 = arith.constant 0 : index
    %432 = vector.load %arg7[%c0_123, %c0_124] : memref<1x128xf32, #tpu.memory_space<vmem>>, vector<1x128xf32>
    %433 = vector.broadcast %432 : vector<1x128xf32> to vector<4x128xf32>
    %434 = arith.addf %431, %433 : vector<4x128xf32>
    %435 = math.tanh %434 : vector<4x128xf32>
    %436 = arith.mulf %435, %8 : vector<4x128xf32>
    %437 = arith.addf %436, %11 : vector<4x128xf32>
    %438 = vector.extract_strided_slice %437 {offsets = [0, 0], sizes = [4, 32], strides = [1, 1]} : vector<4x128xf32> to vector<4x32xf32>
    %439 = vector.extract_strided_slice %437 {offsets = [0, 32], sizes = [4, 32], strides = [1, 1]} : vector<4x128xf32> to vector<4x32xf32>
    %440 = vector.extract_strided_slice %437 {offsets = [0, 64], sizes = [4, 32], strides = [1, 1]} : vector<4x128xf32> to vector<4x32xf32>
    %441 = vector.extract_strided_slice %437 {offsets = [0, 96], sizes = [4, 32], strides = [1, 1]} : vector<4x128xf32> to vector<4x32xf32>
    %442 = arith.mulf %439, %425 : vector<4x32xf32>
    %443 = arith.mulf %438, %440 : vector<4x32xf32>
    %444 = arith.addf %442, %443 : vector<4x32xf32>
    %445 = math.tanh %444 : vector<4x32xf32>
    %446 = arith.mulf %441, %445 : vector<4x32xf32>
    %447 = tpu.concatenate %446, %311 in 1 : vector<4x32xf32>, vector<4x32xf32> -> vector<4x64xf32>
    %448 = arith.truncf %447 : vector<4x64xf32> to vector<4x64xbf16>
    %c0_125 = arith.constant 0 : index
    %c0_126 = arith.constant 0 : index
    %449 = vector.load %arg6[%c0_125, %c0_126] : memref<64x128xbf16, #tpu.memory_space<vmem>>, vector<64x128xbf16>
    %cst_127 = arith.constant dense<0.000000e+00> : vector<4x128xf32>
    %450 = tpu.matmul %448, %449, %cst_127 {dimension_numbers = #tpu.dot_dimension_numbers<[1], [0], [0], [1], [0, 0, 1, 1], [], []>} : vector<4x64xbf16>, vector<64x128xbf16>, vector<4x128xf32> -> vector<4x128xf32>
    %c0_128 = arith.constant 0 : index
    %c0_129 = arith.constant 0 : index
    %451 = vector.load %arg7[%c0_128, %c0_129] : memref<1x128xf32, #tpu.memory_space<vmem>>, vector<1x128xf32>
    %452 = vector.broadcast %451 : vector<1x128xf32> to vector<4x128xf32>
    %453 = arith.addf %450, %452 : vector<4x128xf32>
    %454 = math.tanh %453 : vector<4x128xf32>
    %455 = arith.mulf %454, %8 : vector<4x128xf32>
    %456 = arith.addf %455, %11 : vector<4x128xf32>
    %457 = vector.extract_strided_slice %456 {offsets = [0, 0], sizes = [4, 32], strides = [1, 1]} : vector<4x128xf32> to vector<4x32xf32>
    %458 = vector.extract_strided_slice %456 {offsets = [0, 32], sizes = [4, 32], strides = [1, 1]} : vector<4x128xf32> to vector<4x32xf32>
    %459 = vector.extract_strided_slice %456 {offsets = [0, 64], sizes = [4, 32], strides = [1, 1]} : vector<4x128xf32> to vector<4x32xf32>
    %460 = vector.extract_strided_slice %456 {offsets = [0, 96], sizes = [4, 32], strides = [1, 1]} : vector<4x128xf32> to vector<4x32xf32>
    %461 = arith.mulf %458, %444 : vector<4x32xf32>
    %462 = arith.mulf %457, %459 : vector<4x32xf32>
    %463 = arith.addf %461, %462 : vector<4x32xf32>
    %464 = math.tanh %463 : vector<4x32xf32>
    %465 = arith.mulf %460, %464 : vector<4x32xf32>
    %466 = tpu.concatenate %332, %351, %370, %389, %408, %427, %446, %465 in 1 : vector<4x32xf32>, vector<4x32xf32>, vector<4x32xf32>, vector<4x32xf32>, vector<4x32xf32>, vector<4x32xf32>, vector<4x32xf32>, vector<4x32xf32> -> vector<4x256xf32>
    %467 = arith.truncf %466 : vector<4x256xf32> to vector<4x256xbf16>
    %c0_130 = arith.constant 0 : index
    %c0_131 = arith.constant 0 : index
    %468 = vector.load %arg8[%c0_130, %c0_131] : memref<256x32xbf16, #tpu.memory_space<vmem>>, vector<256x32xbf16>
    %cst_132 = arith.constant dense<0.000000e+00> : vector<4x32xf32>
    %469 = tpu.matmul %467, %468, %cst_132 {dimension_numbers = #tpu.dot_dimension_numbers<[1], [0], [0], [1], [0, 0, 1, 1], [], []>} : vector<4x256xbf16>, vector<256x32xbf16>, vector<4x32xf32> -> vector<4x32xf32>
    %c0_133 = arith.constant 0 : index
    %c0_134 = arith.constant 0 : index
    %470 = vector.load %arg9[%c0_133, %c0_134] : memref<1x32xf32, #tpu.memory_space<vmem>>, vector<1x32xf32>
    %471 = vector.broadcast %470 : vector<1x32xf32> to vector<4x32xf32>
    %472 = arith.addf %469, %471 : vector<4x32xf32>
    %473 = math.tanh %472 : vector<4x32xf32>
    %474 = arith.truncf %473 : vector<4x32xf32> to vector<4x32xbf16>
    %c0_135 = arith.constant 0 : index
    %c0_136 = arith.constant 0 : index
    %475 = vector.load %arg10[%c0_135, %c0_136] : memref<32x32xbf16, #tpu.memory_space<vmem>>, vector<32x32xbf16>
    %cst_137 = arith.constant dense<0.000000e+00> : vector<4x32xf32>
    %476 = tpu.matmul %474, %475, %cst_137 {dimension_numbers = #tpu.dot_dimension_numbers<[1], [0], [0], [1], [0, 0, 1, 1], [], []>} : vector<4x32xbf16>, vector<32x32xbf16>, vector<4x32xf32> -> vector<4x32xf32>
    %c0_138 = arith.constant 0 : index
    %c0_139 = arith.constant 0 : index
    %477 = vector.load %arg11[%c0_138, %c0_139] : memref<1x32xf32, #tpu.memory_space<vmem>>, vector<1x32xf32>
    %478 = vector.broadcast %477 : vector<1x32xf32> to vector<4x32xf32>
    %479 = arith.addf %476, %478 : vector<4x32xf32>
    %cst_140 = arith.constant -1.000000e+00 : f32
    %cst_141 = arith.constant 1.000000e+00 : f32
    %480 = vector.broadcast %cst_140 : f32 to vector<4x32xf32>
    %481 = arith.maximumf %480, %479 : vector<4x32xf32>
    %482 = vector.broadcast %cst_141 : f32 to vector<4x32xf32>
    %483 = arith.minimumf %482, %481 : vector<4x32xf32>
    %484 = arith.truncf %483 : vector<4x32xf32> to vector<4x32xbf16>
    %c0_142 = arith.constant 0 : index
    %c0_143 = arith.constant 0 : index
    %485 = vector.load %arg12[%c0_142, %c0_143] : memref<32x3xbf16, #tpu.memory_space<vmem>>, vector<32x3xbf16>
    %cst_144 = arith.constant dense<0.000000e+00> : vector<4x3xf32>
    %486 = tpu.matmul %484, %485, %cst_144 {dimension_numbers = #tpu.dot_dimension_numbers<[1], [0], [0], [1], [0, 0, 1, 1], [], []>} : vector<4x32xbf16>, vector<32x3xbf16>, vector<4x3xf32> -> vector<4x3xf32>
    %c0_145 = arith.constant 0 : index
    %c0_146 = arith.constant 0 : index
    %487 = vector.load %arg13[%c0_145, %c0_146] : memref<1x3xf32, #tpu.memory_space<vmem>>, vector<1x3xf32>
    %488 = vector.broadcast %487 : vector<1x3xf32> to vector<4x3xf32>
    %489 = arith.addf %486, %488 : vector<4x3xf32>
    %490 = math.exp %489 : vector<4x3xf32>
    %cst_147 = arith.constant dense<0.000000e+00> : vector<4xf32>
    %491 = vector.multi_reduction <add>, %490, %cst_147 [1] : vector<4x3xf32> to vector<4xf32>
    %492 = vector.shape_cast %491 : vector<4xf32> to vector<4x1xf32>
    %493 = vector.broadcast %492 : vector<4x1xf32> to vector<4x3xf32>
    %494 = arith.divf %490, %493 : vector<4x3xf32>
    %c0_148 = arith.constant 0 : index
    %c0_149 = arith.constant 0 : index
    %495 = vector.load %arg14[%c0_148, %c0_149] : memref<4x3xf32, #tpu.memory_space<vmem>>, vector<4x3xf32>
    tpu.vector_store %arg14[%c0_148, %c0_149], %494 {strides = array<i32>} : memref<4x3xf32, #tpu.memory_space<vmem>>, vector<4x3xf32>,
    return
  }
}

</mosaic_0001>

<bundles_post_ra>
// kernel: vanila_lstm_forward.1
= control target key start
LH: loop header
LB: loop body
LE: loop exit
PB: predicated region body
PF: predicated region fallthrough
CT: control target
= control target key end

     0   :  { %v2987_v2 = vmov 0.0   ;;  %vm2988_vm0 = vmmov 0   ;;  %vm101_vm1 = vcmask 523264   ;;  %v2989_v13 = vmov 0   ;;  %s3791_s0 = inlined_call_operand.vmem [shape: f32[32,64], index: 0, kind: input, shape index: {}]   ;;  %s3792_s1 = inlined_call_operand.vmem [shape: bf16[64,128], index: 1, kind: input, shape index: {}]   ;;  %s3793_s2 = inlined_call_operand.vmem [shape: bf16[32,128], index: 2, kind: input, shape index: {}]   ;;  %s3794_s3 = inlined_call_operand.vmem [shape: f32[1,128], index: 3, kind: input, shape index: {}]   ;;  %s3795_s4 = inlined_call_operand.vmem [shape: bf16[64,128], index: 4, kind: input, shape index: {}]   ;;  %s3796_s5 = inlined_call_operand.vmem [shape: f32[1,128], index: 5, kind: input, shape index: {}]   ;;  %s3797_s6 = inlined_call_operand.vmem [shape: bf16[64,128], index: 6, kind: input, shape index: {}]   ;;  %s3798_s7 = inlined_call_operand.vmem [shape: f32[1,128], index: 7, kind: input, shape index: {}]   ;;  %s3799_s8 = inlined_call_operand.vmem [shape: bf16[256,32], index: 8, kind: input, shape index: {}]   ;;  %s3800_s9 = inlined_call_operand.vmem [shape: f32[1,32], index: 9, kind: input, shape index: {}]   ;;  %s3801_s10 = inlined_call_operand.vmem [shape: bf16[32,32], index: 10, kind: input, shape index: {}]   ;;  %s3802_s11 = inlined_call_operand.vmem [shape: f32[1,32], index: 11, kind: input, shape index: {}]   ;;  %s3803_s12 = inlined_call_operand.vmem [shape: bf16[32,3], index: 12, kind: input, shape index: {}]   ;;  %s3804_s13 = inlined_call_operand.vmem [shape: f32[1,3], index: 13, kind: input, shape index: {}]   ;;  %s3805_s14 = inlined_call_operand.hbm [shape: f32[4,3], index: 14, kind: output, shape index: {}]  }
   0x1   :  { %v2828_v0 = vld [vmem:[%s3792_s1 + $0x18] sm:$0xff]   ;;  %v2829_v1 = vld [vmem:[%s3792_s1 + $0x10] sm:$0xff]   ;;  %2538 = vmatprep.subr.bf16.mxu1 %v2987_v2  ;;  %2542 = vmatprep.mubr.msk.bf16.mxu1 %vm2988_vm0, %v2987_v2  ;;  %v2830_v3 = vld [vmem:[%s3792_s1 + $0x8] sm:$0xff]  }
   0x2   :  { %2526 = vmatprep.subr.bf16.mxu0 %v2828_v0  ;;  %v56_v4 = vld [vmem:[%s3791_s0] sm:$0xff]  ;;  %v57_v5 = vld [vmem:[%s3791_s0 + $0x8] sm:$0xff]  ;;  %v58_v10 = vld [vmem:[%s3791_s0 + $0x10] sm:$0xff] }
   0x3   :  { %2527 = vmatpush3.bf16.msra.mxu0 %v2828_v0  ;;  %v60_v6 = vpack.c.bf16 %v57_v5, %v56_v4  ;;  %v2831_v7 = vld [vmem:[%s3792_s1] sm:$0xff]   ;;  %v3094_v8 = vld [vmem:[%s3793_s2 + $0x8] sm:$0xff]   ;;  %v59_v11 = vld [vmem:[%s3791_s0 + $0x18] sm:$0xff] }
   0x4   :  { %2528 = vmatprep.subr.bf16.mxu0 %v2829_v1  ;;  %v3100_v9 = vld [vmem:[%s3793_s2] sm:$0xff]   ;;  %2539 = vmatpush3.bf16.msra.mxu1 %v3094_v8  ;;  %v61_v12 = vpack.c.bf16 %v59_v11, %v58_v10 }
   0x5   :  { %2534 = vmatprep.mubr.msk.bf16.mxu0 %vm101_vm1, %v60_v6  ;;  %2540 = vmatprep.subr.bf16.mxu1 %v2987_v2 }
   0x7   :  { %2529 = vmatpush3.bf16.msra.mxu0 %v2829_v1 }
   0x8   :  { %2530 = vmatprep.subr.bf16.mxu0 %v2830_v3  ;;  %2541 = vmatpush3.bf16.msra.mxu1 %v3100_v9 }
   0x9   :  { %2546 = vmatprep.subr.bf16.mxu1 %v2987_v2 }
   0xb   :  { %2531 = vmatpush3.bf16.msra.mxu0 %v2830_v3  ;;  %2543 = vmatmul.mubr.bf16.vlgmr.msra.gmra.mxu1 %v2989_v13 }
   0xc   :  { %2532 = vmatprep.subr.bf16.mxu0 %v2831_v7  ;;  %2547 = vmatpush3.bf16.msra.mxu1 %v3094_v8 }
   0xd   :  { %2550 = vmatprep.mubr.msk.bf16.mxu1 %vm2988_vm0, %v2987_v2  ;;  %2548 = vmatprep.subr.bf16.mxu1 %v2987_v2 }
   0xf   :  { %2533 = vmatpush3.bf16.msra.mxu0 %v2831_v7 }
  0x10   :  { %2570 = vmatprep.subr.bf16.mxu0 %v2987_v2  ;;  %2549 = vmatpush3.bf16.msra.mxu1 %v3100_v9 }
  0x11   :  { %2554 = vmatprep.subr.bf16.mxu1 %v2987_v2 }
  0x12   :  { %2535 = vmatmul.mubr.msk.bf16.vlgmr.msra.gmra.mxu0 %vm101_vm1, %v61_v12 }
  0x13   :  { %2571 = vmatpush3.bf16.msra.mxu0 %v3094_v8  ;;  %2574 = vmatprep.mubr.msk.bf16.mxu0 %vm2988_vm0, %v2987_v2 }
  0x14   :  { %2572 = vmatprep.subr.bf16.mxu0 %v2987_v2 }
  0x17   :  { %2573 = vmatpush3.bf16.msra.mxu0 %v3100_v9 }
  0x18   :  { %2586 = vmatprep.subr.bf16.mxu0 %v2987_v2 }
  0x19   :  { %19 = vsyncpa [#allocation4], 0  ;;  %v2320_v15 = vld [vmem:[%s3794_s3] ss:$0 sm:$0xff]  ;;  %v49_v28 = vlaneseq  ;;  %v2990_v31 = vmov 0.5   ;;  %s2991_s3 = smov 64  }
  0x1a   :  { %s2992_s16 = smov 32   ;;  %vm178_vm5 = vcmask 261120   ;;  %vm1978_vm6 = vcmask 785408   ;;  %vm2299_vm7 = vcmask 19456  }
  0x1b   :  { %v50_v30 = vand.u32 127, %v49_v28 }
  0x1d   :  { %vm51_vm2 = vcmp.ge.s32.totalorder %v50_v30, 64  ;;  %vm52_vm3 = vcmp.lt.s32.totalorder %v50_v30, 96 }
  0x1e   :  { %vm53_vm4 = vmand %vm51_vm2, %vm52_vm3 }
  0x1f   :  { %v3129_v32 = vsel %vm53_vm4, 1.0, %v2990_v31  ;;  %v3131_v34 = vsel %vm53_vm4, 0.0, %v2990_v31 }
  0xcb   :  { %v216_v14 = vpop.f32.mrf.mxu1 }
  0xcd   :  { %v2544_v16 = vpop.f32.mrf.mxu1 }
  0xcf   :  { %v219_v19 = vpop.f32.mrf.mxu1 }
  0xd1   :  { %v2545_v22 = vpop.f32.mrf.mxu1 }
  0xd2   :  { %v2536_v17 = vpop.f32.mrf.mxu0 }
  0xd3   :  { %v151_v18 = vadd.f32 %v2536_v17, %v2320_v15 }
  0xd4   :  { %v142_v20 = vpop.f32.mrf.mxu0 }
  0xd5   :  { %159 = vst [vmem:[#allocation2 + $0x10] sm:$0xff] %v151_v18  ;;  %v143_v21 = vadd.f32 %v2320_v15, %v142_v20 }
  0xd6   :  { %v2537_v23 = vpop.f32.mrf.mxu0 }
  0xd7   :  { %157 = vst [vmem:[#allocation2] sm:$0xff] %v143_v21  ;;  %v154_v24 = vadd.f32 %v2537_v23, %v2320_v15 }
  0xd8   :  { %v145_v25 = vpop.f32.mrf.mxu0 }
  0xd9   :  { %160 = vst [vmem:[#allocation2 + $0x18] sm:$0xff] %v154_v24  ;;  %v146_v26 = vadd.f32 %v2320_v15, %v145_v25 }
  0xdb   :  { %158 = vst [vmem:[#allocation2 + $0x8] sm:$0xff] %v146_v26 }
  0xe2   :  { %v161_v27 = vld [vmem:[#allocation2] ss:$8 sm:$0xf]  ;;  %v244_v47 = vld [vmem:[#allocation2 + $0x1] ss:$8 sm:$0xf] }
  0xe3   :  { %v222_v29 = vadd.f32 %v216_v14, %v161_v27  ;;  %v314_v3 = vld [vmem:[#allocation2 + $0x2] ss:$8 sm:$0xf]  ;;  %v384_v24 = vld [vmem:[#allocation2 + $0x3] ss:$8 sm:$0xf] }
  0xe5   :  { %2862 = vtanh.f32 %v222_v29 }
  0xf2   :  { %v2863_v33 = vpop.eup %2862 }
  0xf3   :  { %v224_v35 = vmul.f32 %v2863_v33, %v3129_v32 }
  0xf5   :  { %v225_v36 = vadd.f32 %v224_v35, %v3131_v34 }
  0xf7   :  { %228 = vrot.lane.b32.xlu0 %v225_v36, %s2991_s3  ;;  %v226_v39 = vmul.f32 0.0, %v225_v36 }
 0x169   :  { %v229_v37 = vpop.permute.xlu0 %228 }
 0x16a   :  { %v231_v38 = vmul.f32 %v229_v37, %v225_v36 }
 0x16c   :  { %233 = vrot.lane.b32.xlu0 %v231_v38, %s2992_s16 }
 0x1de   :  { %v234_v40 = vpop.permute.xlu0 %233 }
 0x1df   :  { %v236_v41 = vadd.f32 %v234_v40, %v226_v39 }
 0x1e1   :  { %2864 = vtanh.f32 %v236_v41 }
 0x1ee   :  { %v2865_v42 = vpop.eup %2864 }
 0x1ef   :  { %239 = vrot.lane.b32.xlu1 %v2865_v42, %s2991_s3 }
 0x261   :  { %v240_v43 = vpop.permute.xlu1 %239 }
 0x262   :  { %v3138_v44 = vmul.f32 %v240_v43, %v225_v36 }
 0x264   :  { %v245_v45 = vpack.c.bf16 %v3138_v44, %v3138_v44 }
 0x266   :  { %247 = vrot.lane.b32.xlu1 %v245_v45, %s2992_s16 }
 0x2d8   :  { %v248_v46 = vpop.permute.xlu1 %247 }
 0x2d9   :  { %2551 = vmatmul.mubr.msk.bf16.vlgmr.msra.gmra.mxu1 %vm178_vm5, %v248_v46  ;;  %v454_v46 = vld [vmem:[#allocation2 + $0x4] ss:$8 sm:$0xf] }
 0x2da   :  { %2555 = vmatpush3.bf16.msra.mxu1 %v3094_v8  ;;  %2558 = vmatprep.mubr.msk.bf16.mxu1 %vm2988_vm0, %v2987_v2 }
 0x2db   :  { %2556 = vmatprep.subr.bf16.mxu1 %v2987_v2 }
 0x2de   :  { %2557 = vmatpush3.bf16.msra.mxu1 %v3100_v9 }
 0x2df   :  { %2562 = vmatprep.subr.bf16.mxu1 %v2987_v2 }
 0x399   :  { %v286_v48 = vpop.f32.mrf.mxu1 }
 0x39a   :  { %v292_v49 = vadd.f32 %v286_v48, %v244_v47 }
 0x39b   :  { %v2552_v50 = vpop.f32.mrf.mxu1 }
 0x39c   :  { %2866 = vtanh.f32 %v292_v49 }
 0x39d   :  { %v289_v51 = vpop.f32.mrf.mxu1 }
 0x39f   :  { %v2553_v52 = vpop.f32.mrf.mxu1 }
 0x3a9   :  { %v2867_v53 = vpop.eup %2866 }
 0x3aa   :  { %v294_v54 = vmul.f32 %v2867_v53, %v3129_v32 }
 0x3ac   :  { %v295_v55 = vadd.f32 %v294_v54, %v3131_v34 }
 0x3ae   :  { %298 = vrot.lane.b32.xlu0 %v295_v55, %s2991_s3  ;;  %v296_v58 = vmul.f32 %v295_v55, %v236_v41 }
 0x420   :  { %v299_v56 = vpop.permute.xlu0 %298 }
 0x421   :  { %v301_v57 = vmul.f32 %v299_v56, %v295_v55 }
 0x423   :  { %303 = vrot.lane.b32.xlu1 %v301_v57, %s2992_s16 }
 0x495   :  { %v304_v59 = vpop.permute.xlu1 %303 }
 0x496   :  { %v306_v60 = vadd.f32 %v304_v59, %v296_v58 }
 0x498   :  { %2868 = vtanh.f32 %v306_v60 }
 0x4a5   :  { %v2869_v61 = vpop.eup %2868 }
 0x4a6   :  { %309 = vrot.lane.b32.xlu0 %v2869_v61, %s2991_s3 }
 0x518   :  { %v310_v62 = vpop.permute.xlu0 %309 }
 0x519   :  { %v3155_v63 = vmul.f32 %v310_v62, %v295_v55 }
 0x51b   :  { %v315_v0 = vpack.c.bf16 %v3155_v63, %v3155_v63 }
 0x51d   :  { %317 = vrot.lane.b32.xlu1 %v315_v0, %s2992_s16 }
 0x58f   :  { %v318_v1 = vpop.permute.xlu1 %317 }
 0x590   :  { %2559 = vmatmul.mubr.msk.bf16.vlgmr.msra.gmra.mxu1 %vm178_vm5, %v318_v1 }
 0x591   :  { %2563 = vmatpush3.bf16.msra.mxu1 %v3094_v8  ;;  %2566 = vmatprep.mubr.msk.bf16.mxu1 %vm2988_vm0, %v2987_v2 }
 0x592   :  { %2564 = vmatprep.subr.bf16.mxu1 %v2987_v2 }
 0x595   :  { %2565 = vmatpush3.bf16.msra.mxu1 %v3100_v9 }
 0x596   :  { %2578 = vmatprep.subr.bf16.mxu1 %v2987_v2 }
 0x650   :  { %v356_v4 = vpop.f32.mrf.mxu1 }
 0x651   :  { %v362_v5 = vadd.f32 %v356_v4, %v314_v3  ;;  %v524_v3 = vld [vmem:[#allocation2 + $0x5] ss:$8 sm:$0xf] }
 0x652   :  { %v2560_v6 = vpop.f32.mrf.mxu1 }
 0x653   :  { %2870 = vtanh.f32 %v362_v5 }
 0x654   :  { %v359_v7 = vpop.f32.mrf.mxu1 }
 0x656   :  { %v2561_v10 = vpop.f32.mrf.mxu1 }
 0x660   :  { %v2871_v11 = vpop.eup %2870 }
 0x661   :  { %v364_v12 = vmul.f32 %v2871_v11, %v3129_v32 }
 0x663   :  { %v365_v13 = vadd.f32 %v364_v12, %v3131_v34 }
 0x665   :  { %368 = vrot.lane.b32.xlu0 %v365_v13, %s2991_s3  ;;  %v366_v16 = vmul.f32 %v365_v13, %v306_v60 }
 0x6d7   :  { %v369_v14 = vpop.permute.xlu0 %368 }
 0x6d8   :  { %v371_v15 = vmul.f32 %v369_v14, %v365_v13 }
 0x6da   :  { %373 = vrot.lane.b32.xlu1 %v371_v15, %s2992_s16 }
 0x74c   :  { %v374_v17 = vpop.permute.xlu1 %373 }
 0x74d   :  { %v376_v18 = vadd.f32 %v374_v17, %v366_v16 }
 0x74f   :  { %2872 = vtanh.f32 %v376_v18 }
 0x75c   :  { %v2873_v19 = vpop.eup %2872 }
 0x75d   :  { %379 = vrot.lane.b32.xlu0 %v2873_v19, %s2991_s3 }
 0x7cf   :  { %v380_v20 = vpop.permute.xlu0 %379 }
 0x7d0   :  { %v3172_v21 = vmul.f32 %v380_v20, %v365_v13 }
 0x7d2   :  { %v385_v22 = vpack.c.bf16 %v3172_v21, %v3172_v21 }
 0x7d4   :  { %387 = vrot.lane.b32.xlu1 %v385_v22, %s2992_s16  ;;  %v3236_v22 = vld [vmem:[%s3795_s4 + $0x18] sm:$0xff]  }
 0x846   :  { %v388_v23 = vpop.permute.xlu1 %387 }
 0x847   :  { %2567 = vmatmul.mubr.msk.bf16.vlgmr.msra.gmra.mxu1 %vm178_vm5, %v388_v23 }
 0x848   :  { %2579 = vmatpush3.bf16.msra.mxu1 %v3094_v8  ;;  %2582 = vmatprep.mubr.msk.bf16.mxu1 %vm2988_vm0, %v2987_v2 }
 0x849   :  { %2580 = vmatprep.subr.bf16.mxu1 %v2987_v2 }
 0x84c   :  { %2581 = vmatpush3.bf16.msra.mxu1 %v3100_v9 }
 0x84d   :  { %2594 = vmatprep.subr.bf16.mxu1 %v2987_v2 }
 0x907   :  { %v426_v25 = vpop.f32.mrf.mxu1 }
 0x908   :  { %v432_v26 = vadd.f32 %v426_v25, %v384_v24  ;;  %v3252_v24 = vld [vmem:[%s3795_s4 + $0x8] sm:$0xff]  }
 0x909   :  { %v2568_v27 = vpop.f32.mrf.mxu1 }
 0x90a   :  { %2874 = vtanh.f32 %v432_v26  ;;  %v3259_v26 = vld [vmem:[%s3795_s4] sm:$0xff]  }
 0x90b   :  { %v429_v28 = vpop.f32.mrf.mxu1 }
 0x90d   :  { %v2569_v29 = vpop.f32.mrf.mxu1 }
 0x90e   :  { %v594_v29 = vld [vmem:[#allocation2 + $0x6] ss:$8 sm:$0xf] }
 0x917   :  { %v2875_v30 = vpop.eup %2874 }
 0x918   :  { %v434_v31 = vmul.f32 %v2875_v30, %v3129_v32 }
 0x91a   :  { %v435_v33 = vadd.f32 %v434_v31, %v3131_v34 }
 0x91c   :  { %438 = vrot.lane.b32.xlu0 %v435_v33, %s2991_s3  ;;  %v436_v37 = vmul.f32 %v435_v33, %v376_v18 }
 0x98e   :  { %v439_v35 = vpop.permute.xlu0 %438 }
 0x98f   :  { %v441_v36 = vmul.f32 %v439_v35, %v435_v33 }
 0x991   :  { %443 = vrot.lane.b32.xlu1 %v441_v36, %s2992_s16 }
 0xa03   :  { %v444_v38 = vpop.permute.xlu1 %443 }
 0xa04   :  { %v446_v39 = vadd.f32 %v444_v38, %v436_v37  ;;  %v3279_v37 = vld [vmem:[%s3796_s5] ss:$0 sm:$0xff] }
 0xa06   :  { %2876 = vtanh.f32 %v446_v39 }
 0xa13   :  { %v2877_v40 = vpop.eup %2876 }
 0xa14   :  { %449 = vrot.lane.b32.xlu0 %v2877_v40, %s2991_s3 }
 0xa86   :  { %v450_v41 = vpop.permute.xlu0 %449 }
 0xa87   :  { %v3189_v42 = vmul.f32 %v450_v41, %v435_v33 }
 0xa89   :  { %v455_v43 = vpack.c.bf16 %v3189_v42, %v3189_v42 }
 0xa8b   :  { %457 = vrot.lane.b32.xlu1 %v455_v43, %s2992_s16 }
 0xafd   :  { %v458_v45 = vpop.permute.xlu1 %457 }
 0xafe   :  { %2575 = vmatmul.mubr.msk.bf16.vlgmr.msra.gmra.mxu0 %vm178_vm5, %v458_v45 }
 0xaff   :  { %2587 = vmatpush3.bf16.msra.mxu0 %v3094_v8  ;;  %2590 = vmatprep.mubr.msk.bf16.mxu0 %vm2988_vm0, %v2987_v2 }
 0xb00   :  { %2588 = vmatprep.subr.bf16.mxu0 %v2987_v2 }
 0xb03   :  { %2589 = vmatpush3.bf16.msra.mxu0 %v3100_v9 }
 0xb04   :  { %2602 = vmatprep.subr.bf16.mxu0 %v2987_v2 }
 0xbbe   :  { %v496_v47 = vpop.f32.mrf.mxu0 }
 0xbbf   :  { %v502_v48 = vadd.f32 %v496_v47, %v454_v46 }
 0xbc0   :  { %v2576_v49 = vpop.f32.mrf.mxu0 }
 0xbc1   :  { %2878 = vtanh.f32 %v502_v48 }
 0xbc2   :  { %v499_v50 = vpop.f32.mrf.mxu0 }
 0xbc4   :  { %v2577_v51 = vpop.f32.mrf.mxu0 }
 0xbce   :  { %v2879_v52 = vpop.eup %2878 }
 0xbcf   :  { %v504_v53 = vmul.f32 %v2879_v52, %v3129_v32 }
 0xbd1   :  { %v505_v54 = vadd.f32 %v504_v53, %v3131_v34 }
 0xbd3   :  { %508 = vrot.lane.b32.xlu0 %v505_v54, %s2991_s3  ;;  %v506_v57 = vmul.f32 %v505_v54, %v446_v39 }
 0xc45   :  { %v509_v55 = vpop.permute.xlu0 %508 }
 0xc46   :  { %v511_v56 = vmul.f32 %v509_v55, %v505_v54 }
 0xc48   :  { %513 = vrot.lane.b32.xlu1 %v511_v56, %s2992_s16 }
 0xcba   :  { %v514_v58 = vpop.permute.xlu1 %513 }
 0xcbb   :  { %v516_v59 = vadd.f32 %v514_v58, %v506_v57 }
 0xcbd   :  { %2880 = vtanh.f32 %v516_v59 }
 0xcca   :  { %v2881_v60 = vpop.eup %2880 }
 0xccb   :  { %519 = vrot.lane.b32.xlu0 %v2881_v60, %s2991_s3 }
 0xd3d   :  { %v520_v61 = vpop.permute.xlu0 %519 }
 0xd3e   :  { %v3206_v62 = vmul.f32 %v520_v61, %v505_v54 }
 0xd40   :  { %v525_v0 = vpack.c.bf16 %v3206_v62, %v3206_v62 }
 0xd42   :  { %527 = vrot.lane.b32.xlu1 %v525_v0, %s2992_s16 }
 0xdb4   :  { %v528_v1 = vpop.permute.xlu1 %527 }
 0xdb5   :  { %2583 = vmatmul.mubr.msk.bf16.vlgmr.msra.gmra.mxu1 %vm178_vm5, %v528_v1 }
 0xdb6   :  { %2595 = vmatpush3.bf16.msra.mxu1 %v3094_v8  ;;  %2598 = vmatprep.mubr.msk.bf16.mxu1 %vm2988_vm0, %v2987_v2 }
 0xdb7   :  { %2596 = vmatprep.subr.bf16.mxu1 %v2987_v2 }
 0xdba   :  { %2597 = vmatpush3.bf16.msra.mxu1 %v3100_v9 }
 0xdbb   :  { %2614 = vmatprep.subr.bf16.mxu1 %v2987_v2 }
 0xe75   :  { %v566_v4 = vpop.f32.mrf.mxu1 }
 0xe76   :  { %v572_v5 = vadd.f32 %v566_v4, %v524_v3 }
 0xe77   :  { %v2584_v6 = vpop.f32.mrf.mxu1 }
 0xe78   :  { %2882 = vtanh.f32 %v572_v5 }
 0xe79   :  { %v569_v7 = vpop.f32.mrf.mxu1 }
 0xe7b   :  { %v2585_v10 = vpop.f32.mrf.mxu1 }
 0xe85   :  { %v2883_v11 = vpop.eup %2882 }
 0xe86   :  { %v574_v12 = vmul.f32 %v2883_v11, %v3129_v32 }
 0xe88   :  { %v575_v8 = vadd.f32 %v574_v12, %v3131_v34 }
 0xe8a   :  { %578 = vrot.lane.b32.xlu0 %v575_v8, %s2991_s3  ;;  %v576_v9 = vmul.f32 %v575_v8, %v516_v59 }
 0xefc   :  { %v579_v13 = vpop.permute.xlu0 %578 }
 0xefd   :  { %v581_v14 = vmul.f32 %v579_v13, %v575_v8 }
 0xeff   :  { %583 = vrot.lane.b32.xlu1 %v581_v14, %s2992_s16 }
 0xf71   :  { %v584_v15 = vpop.permute.xlu1 %583 }
 0xf72   :  { %v3222_v16 = vadd.f32 %v584_v15, %v576_v9 }
 0xf74   :  { %2884 = vtanh.f32 %v3222_v16 }
 0xf81   :  { %v2885_v17 = vpop.eup %2884 }
 0xf82   :  { %589 = vrot.lane.b32.xlu0 %v2885_v17, %s2991_s3 }
 0xf86   :  { %734 = vrot.lane.b32.xlu0 %v3138_v44, %s2991_s3  ;;  %v3243_v44 = vld [vmem:[%s3795_s4 + $0x10] sm:$0xff]   ;;  %s2993_s4 = smov 96  }
 0xff4   :  { %v590_v18 = vpop.permute.xlu0 %589 }
 0xff5   :  { %v3228_v19 = vmul.f32 %v590_v18, %v575_v8 }
 0xff7   :  { %v595_v20 = vpack.c.bf16 %v3228_v19, %v3228_v19 }
 0xff8   :  { %v735_v25 = vpop.permute.xlu0 %734 }
 0xff9   :  { %597 = vrot.lane.b32.xlu1 %v595_v20, %s2992_s16  ;;  %v737_v27 = vsel %vm178_vm5, 0.0, %v735_v25 }
 0xffa   :  { %v738_v28 = vpack.c.bf16 %v737_v27, %v737_v27 }
0x106b   :  { %v598_v23 = vpop.permute.xlu1 %597 }
0x106c   :  { %2591 = vmatmul.mubr.msk.bf16.vlgmr.msra.gmra.mxu0 %vm178_vm5, %v598_v23 }
0x106d   :  { %2603 = vmatpush3.bf16.msra.mxu0 %v3236_v22  ;;  %2610 = vmatprep.mubr.msk.bf16.mxu0 %vm2988_vm0, %v2987_v2 }
0x106e   :  { %2604 = vmatprep.subr.bf16.mxu0 %v2987_v2 }
0x1071   :  { %2605 = vmatpush3.bf16.msra.mxu0 %v3243_v44 }
0x1072   :  { %2606 = vmatprep.subr.bf16.mxu0 %v2987_v2 }
0x1075   :  { %2607 = vmatpush3.bf16.msra.mxu0 %v3252_v24 }
0x1076   :  { %2608 = vmatprep.subr.bf16.mxu0 %v2987_v2 }
0x1079   :  { %2609 = vmatpush3.bf16.msra.mxu0 %v3259_v26 }
0x107a   :  { %2626 = vmatprep.subr.bf16.mxu0 %v2987_v2 }
0x107c   :  { %2611 = vmatmul.mubr.msk.bf16.vlgmr.msra.gmra.mxu0 %vm101_vm1, %v738_v28 }
0x107d   :  { %2627 = vmatpush3.bf16.msra.mxu0 %v3236_v22  ;;  %2634 = vmatprep.mubr.msk.bf16.mxu0 %vm2988_vm0, %v2987_v2 }
0x107e   :  { %2628 = vmatprep.subr.bf16.mxu0 %v2987_v2 }
0x1081   :  { %2629 = vmatpush3.bf16.msra.mxu0 %v3243_v44 }
0x1082   :  { %2630 = vmatprep.subr.bf16.mxu0 %v2987_v2 }
0x1085   :  { %2631 = vmatpush3.bf16.msra.mxu0 %v3252_v24 }
0x1086   :  { %2632 = vmatprep.subr.bf16.mxu0 %v2987_v2 }
0x1089   :  { %2633 = vmatpush3.bf16.msra.mxu0 %v3259_v26 }
0x108a   :  { %2650 = vmatprep.subr.bf16.mxu0 %v2987_v2 }
0x112c   :  { %v636_v30 = vpop.f32.mrf.mxu0 }
0x112d   :  { %v642_v31 = vadd.f32 %v636_v30, %v594_v29 }
0x112e   :  { %v2592_v33 = vpop.f32.mrf.mxu0 }
0x112f   :  { %2886 = vtanh.f32 %v642_v31 }
0x1130   :  { %v639_v35 = vpop.f32.mrf.mxu0 }
0x1132   :  { %v2593_v36 = vpop.f32.mrf.mxu0 }
0x113c   :  { %v2887_v38 = vpop.eup %2886  ;;  %v815_v39 = vpop.f32.mrf.mxu0 }
0x113d   :  { %v816_v40 = vadd.f32 %v3279_v37, %v815_v39  ;;  %v644_v41 = vmul.f32 %v2887_v38, %v3129_v32 }
0x113e   :  { %v2612_v43 = vpop.f32.mrf.mxu0 }
0x113f   :  { %2888 = vtanh.f32 %v816_v40  ;;  %v645_v45 = vadd.f32 %v644_v41, %v3131_v34 }
0x1140   :  { %v818_v46 = vpop.f32.mrf.mxu0 }
0x1141   :  { %648 = vrot.lane.b32.xlu1 %v645_v45, %s2991_s3  ;;  %v646_v55 = vmul.f32 %v645_v45, %v3222_v16 }
0x1142   :  { %v2613_v47 = vpop.f32.mrf.mxu0 }
0x114c   :  { %v2889_v48 = vpop.eup %2888 }
0x114d   :  { %v822_v49 = vmul.f32 %v2889_v48, %v3129_v32 }
0x114f   :  { %v823_v50 = vadd.f32 %v822_v49, %v3131_v34 }
0x1151   :  { %826 = vrot.lane.b32.xlu0 %v823_v50, %s2991_s3  ;;  %v824_v58 = vmul.f32 0.0, %v823_v50 }
0x11b3   :  { %v649_v51 = vpop.permute.xlu1 %648 }
0x11b4   :  { %v651_v52 = vmul.f32 %v649_v51, %v645_v45 }
0x11b6   :  { %653 = vrot.lane.b32.xlu1 %v651_v52, %s2992_s16 }
0x11c3   :  { %v827_v53 = vpop.permute.xlu0 %826 }
0x11c4   :  { %v829_v54 = vmul.f32 %v827_v53, %v823_v50 }
0x11c6   :  { %831 = vrot.lane.b32.xlu0 %v829_v54, %s2992_s16 }
0x1228   :  { %v654_v56 = vpop.permute.xlu1 %653 }
0x1229   :  { %v3291_v57 = vadd.f32 %v654_v56, %v646_v55 }
0x122b   :  { %2890 = vtanh.f32 %v3291_v57 }
0x1238   :  { %v2891_v59 = vpop.eup %2890  ;;  %v832_v60 = vpop.permute.xlu0 %831 }
0x1239   :  { %v834_v61 = vadd.f32 %v832_v60, %v824_v58  ;;  %659 = vrot.lane.b32.xlu1 %v2891_v59, %s2991_s3 }
0x123b   :  { %2892 = vtanh.f32 %v834_v61 }
0x1248   :  { %v2893_v0 = vpop.eup %2892 }
0x1249   :  { %837 = vrot.lane.b32.xlu0 %v2893_v0, %s2991_s3 }
0x12ab   :  { %v660_v1 = vpop.permute.xlu1 %659 }
0x12ac   :  { %v3296_v3 = vmul.f32 %v660_v1, %v645_v45 }
0x12ae   :  { %v665_v4 = vpack.c.bf16 %v3296_v3, %v3296_v3 }
0x12b0   :  { %667 = vrot.lane.b32.xlu1 %v665_v4, %s2992_s16 }
0x12b4   :  { %846 = vrot.lane.b32.xlu1 %v3155_v63, %s2991_s3 }
0x12bb   :  { %v838_v5 = vpop.permute.xlu0 %837 }
0x12bc   :  { %v3303_v6 = vmul.f32 %v838_v5, %v823_v50 }
0x12be   :  { %842 = vrot.lane.b32.xlu0 %v3303_v6, %s2992_s16 }
0x1322   :  { %v668_v7 = vpop.permute.xlu1 %667 }
0x1323   :  { %2599 = vmatmul.mubr.msk.bf16.vlgmr.msra.gmra.mxu1 %vm178_vm5, %v668_v7 }
0x1324   :  { %2615 = vmatpush3.bf16.msra.mxu1 %v3236_v22  ;;  %2622 = vmatprep.mubr.msk.bf16.mxu1 %vm2988_vm0, %v2987_v2 }
0x1325   :  { %2616 = vmatprep.subr.bf16.mxu1 %v2987_v2 }
0x1326   :  { %v847_v63 = vpop.permute.xlu1 %846 }
0x1328   :  { %2617 = vmatpush3.bf16.msra.mxu1 %v3243_v44 }
0x1329   :  { %2618 = vmatprep.subr.bf16.mxu1 %v2987_v2 }
0x132c   :  { %2619 = vmatpush3.bf16.msra.mxu1 %v3252_v24 }
0x132d   :  { %2620 = vmatprep.subr.bf16.mxu1 %v2987_v2 }
0x1330   :  { %v843_v10 = vpop.permute.xlu0 %842  ;;  %2621 = vmatpush3.bf16.msra.mxu1 %v3259_v26 }
0x1331   :  { %v849_v11 = vsel %vm178_vm5, %v843_v10, %v847_v63  ;;  %2638 = vmatprep.subr.bf16.mxu1 %v2987_v2 }
0x1332   :  { %v850_v12 = vpack.c.bf16 %v849_v11, %v849_v11 }
0x1334   :  { %2623 = vmatmul.mubr.msk.bf16.vlgmr.msra.gmra.mxu1 %vm101_vm1, %v850_v12 }
0x1335   :  { %2639 = vmatpush3.bf16.msra.mxu1 %v3236_v22  ;;  %2646 = vmatprep.mubr.msk.bf16.mxu1 %vm2988_vm0, %v2987_v2 }
0x1336   :  { %2640 = vmatprep.subr.bf16.mxu1 %v2987_v2 }
0x1339   :  { %2641 = vmatpush3.bf16.msra.mxu1 %v3243_v44 }
0x133a   :  { %2642 = vmatprep.subr.bf16.mxu1 %v2987_v2 }
0x133d   :  { %2643 = vmatpush3.bf16.msra.mxu1 %v3252_v24 }
0x133e   :  { %2644 = vmatprep.subr.bf16.mxu1 %v2987_v2 }
0x1341   :  { %2645 = vmatpush3.bf16.msra.mxu1 %v3259_v26 }
0x1342   :  { %2662 = vmatprep.subr.bf16.mxu1 %v2987_v2 }
0x13e3   :  { %v3330_v8 = vpop.f32.mrf.mxu1 }
0x13e5   :  { %v2600_v13 = vpop.f32.mrf.mxu1 }
0x13e7   :  { %v709_v14 = vpop.f32.mrf.mxu1 }
0x13e9   :  { %v2601_v9 = vpop.f32.mrf.mxu1 }
0x13f4   :  { %v888_v15 = vpop.f32.mrf.mxu1 }
0x13f5   :  { %v889_v16 = vadd.f32 %v3279_v37, %v888_v15 }
0x13f6   :  { %v2624_v17 = vpop.f32.mrf.mxu1 }
0x13f7   :  { %2894 = vtanh.f32 %v889_v16 }
0x13f8   :  { %v891_v18 = vpop.f32.mrf.mxu1 }
0x13fa   :  { %v2625_v20 = vpop.f32.mrf.mxu1 }
0x1404   :  { %v2895_v23 = vpop.eup %2894 }
0x1405   :  { %v895_v25 = vmul.f32 %v2895_v23, %v3129_v32 }
0x1407   :  { %v896_v27 = vadd.f32 %v895_v25, %v3131_v34 }
0x1409   :  { %899 = vrot.lane.b32.xlu0 %v896_v27, %s2991_s3  ;;  %v897_v30 = vmul.f32 %v896_v27, %v834_v61 }
0x147b   :  { %v900_v28 = vpop.permute.xlu0 %899 }
0x147c   :  { %v902_v29 = vmul.f32 %v900_v28, %v896_v27 }
0x147e   :  { %904 = vrot.lane.b32.xlu1 %v902_v29, %s2992_s16 }
0x14f0   :  { %v905_v31 = vpop.permute.xlu1 %904 }
0x14f1   :  { %v907_v33 = vadd.f32 %v905_v31, %v897_v30 }
0x14f3   :  { %2896 = vtanh.f32 %v907_v33 }
0x1500   :  { %v2897_v35 = vpop.eup %2896 }
0x1501   :  { %910 = vrot.lane.b32.xlu0 %v2897_v35, %s2991_s3 }
0x1505   :  { %919 = vrot.lane.b32.xlu0 %v3172_v21, %s2991_s3 }
0x1573   :  { %v911_v36 = vpop.permute.xlu0 %910 }
0x1574   :  { %v3340_v38 = vmul.f32 %v911_v36, %v896_v27 }
0x1576   :  { %915 = vrot.lane.b32.xlu1 %v3340_v38, %s2992_s16 }
0x1577   :  { %v920_v39 = vpop.permute.xlu0 %919 }
0x15e8   :  { %v916_v40 = vpop.permute.xlu1 %915 }
0x15e9   :  { %v922_v41 = vsel %vm178_vm5, %v916_v40, %v920_v39 }
0x15ea   :  { %v923_v43 = vpack.c.bf16 %v922_v41, %v922_v41 }
0x15ec   :  { %2635 = vmatmul.mubr.msk.bf16.vlgmr.msra.gmra.mxu0 %vm101_vm1, %v923_v43 }
0x15ed   :  { %2651 = vmatpush3.bf16.msra.mxu0 %v3236_v22  ;;  %2658 = vmatprep.mubr.msk.bf16.mxu0 %vm2988_vm0, %v2987_v2 }
0x15ee   :  { %2652 = vmatprep.subr.bf16.mxu0 %v2987_v2 }
0x15f1   :  { %2653 = vmatpush3.bf16.msra.mxu0 %v3243_v44 }
0x15f2   :  { %2654 = vmatprep.subr.bf16.mxu0 %v2987_v2 }
0x15f5   :  { %2655 = vmatpush3.bf16.msra.mxu0 %v3252_v24 }
0x15f6   :  { %2656 = vmatprep.subr.bf16.mxu0 %v2987_v2 }
0x15f9   :  { %2657 = vmatpush3.bf16.msra.mxu0 %v3259_v26 }
0x15fa   :  { %2674 = vmatprep.subr.bf16.mxu0 %v2987_v2 }
0x16ac   :  { %v961_v21 = vpop.f32.mrf.mxu0 }
0x16ad   :  { %v962_v45 = vadd.f32 %v3279_v37, %v961_v21 }
0x16ae   :  { %v2636_v46 = vpop.f32.mrf.mxu0 }
0x16af   :  { %2898 = vtanh.f32 %v962_v45 }
0x16b0   :  { %v964_v47 = vpop.f32.mrf.mxu0 }
0x16b2   :  { %v2637_v48 = vpop.f32.mrf.mxu0 }
0x16bc   :  { %v2899_v49 = vpop.eup %2898 }
0x16bd   :  { %v968_v50 = vmul.f32 %v2899_v49, %v3129_v32 }
0x16bf   :  { %v969_v51 = vadd.f32 %v968_v50, %v3131_v34 }
0x16c1   :  { %972 = vrot.lane.b32.xlu1 %v969_v51, %s2991_s3  ;;  %v970_v54 = vmul.f32 %v969_v51, %v907_v33 }
0x1733   :  { %v973_v52 = vpop.permute.xlu1 %972 }
0x1734   :  { %v975_v53 = vmul.f32 %v973_v52, %v969_v51 }
0x1736   :  { %977 = vrot.lane.b32.xlu0 %v975_v53, %s2992_s16 }
0x17a8   :  { %v978_v55 = vpop.permute.xlu0 %977 }
0x17a9   :  { %v980_v56 = vadd.f32 %v978_v55, %v970_v54 }
0x17ab   :  { %2900 = vtanh.f32 %v980_v56 }
0x17b8   :  { %v2901_v58 = vpop.eup %2900 }
0x17b9   :  { %983 = vrot.lane.b32.xlu1 %v2901_v58, %s2991_s3 }
0x17bd   :  { %992 = vrot.lane.b32.xlu1 %v3189_v42, %s2991_s3 }
0x182b   :  { %v984_v59 = vpop.permute.xlu1 %983 }
0x182c   :  { %v3364_v60 = vmul.f32 %v984_v59, %v969_v51 }
0x182e   :  { %988 = vrot.lane.b32.xlu0 %v3364_v60, %s2992_s16 }
0x182f   :  { %v993_v61 = vpop.permute.xlu1 %992 }
0x18a0   :  { %v989_v0 = vpop.permute.xlu0 %988 }
0x18a1   :  { %v995_v1 = vsel %vm178_vm5, %v989_v0, %v993_v61 }
0x18a2   :  { %v996_v4 = vpack.c.bf16 %v995_v1, %v995_v1 }
0x18a4   :  { %2647 = vmatmul.mubr.msk.bf16.vlgmr.msra.gmra.mxu1 %vm101_vm1, %v996_v4 }
0x18a5   :  { %2663 = vmatpush3.bf16.msra.mxu1 %v3236_v22  ;;  %2670 = vmatprep.mubr.msk.bf16.mxu1 %vm2988_vm0, %v2987_v2 }
0x18a6   :  { %2664 = vmatprep.subr.bf16.mxu1 %v2987_v2 }
0x18a9   :  { %2665 = vmatpush3.bf16.msra.mxu1 %v3243_v44 }
0x18aa   :  { %2666 = vmatprep.subr.bf16.mxu1 %v2987_v2 }
0x18ad   :  { %2667 = vmatpush3.bf16.msra.mxu1 %v3252_v24 }
0x18ae   :  { %2668 = vmatprep.subr.bf16.mxu1 %v2987_v2 }
0x18b1   :  { %2669 = vmatpush3.bf16.msra.mxu1 %v3259_v26 }
0x18b2   :  { %2686 = vmatprep.subr.bf16.mxu1 %v2987_v2 }
0x1964   :  { %v1034_v42 = vpop.f32.mrf.mxu1 }
0x1965   :  { %v1035_v5 = vadd.f32 %v3279_v37, %v1034_v42 }
0x1966   :  { %v2648_v7 = vpop.f32.mrf.mxu1 }
0x1967   :  { %2902 = vtanh.f32 %v1035_v5 }
0x1968   :  { %v1037_v63 = vpop.f32.mrf.mxu1 }
0x196a   :  { %v2649_v10 = vpop.f32.mrf.mxu1 }
0x1974   :  { %v2903_v11 = vpop.eup %2902 }
0x1975   :  { %v1041_v12 = vmul.f32 %v2903_v11, %v3129_v32 }
0x1977   :  { %v1042_v13 = vadd.f32 %v1041_v12, %v3131_v34 }
0x1979   :  { %1045 = vrot.lane.b32.xlu0 %v1042_v13, %s2991_s3  ;;  %v1043_v15 = vmul.f32 %v1042_v13, %v980_v56 }
0x19eb   :  { %v1046_v14 = vpop.permute.xlu0 %1045 }
0x19ec   :  { %v1048_v9 = vmul.f32 %v1046_v14, %v1042_v13 }
0x19ee   :  { %1050 = vrot.lane.b32.xlu1 %v1048_v9, %s2992_s16 }
0x1a60   :  { %v1051_v16 = vpop.permute.xlu1 %1050 }
0x1a61   :  { %v1053_v17 = vadd.f32 %v1051_v16, %v1043_v15  ;;  %v3463_v15 = vld [vmem:[%s3797_s6 + $0x10] sm:$0xff]  }
0x1a63   :  { %2904 = vtanh.f32 %v1053_v17 }
0x1a70   :  { %v2905_v18 = vpop.eup %2904 }
0x1a71   :  { %1056 = vrot.lane.b32.xlu0 %v2905_v18, %s2991_s3 }
0x1a75   :  { %1065 = vrot.lane.b32.xlu0 %v3206_v62, %s2991_s3 }
0x1ae3   :  { %v1057_v20 = vpop.permute.xlu0 %1056 }
0x1ae4   :  { %v3388_v23 = vmul.f32 %v1057_v20, %v1042_v13 }
0x1ae6   :  { %1061 = vrot.lane.b32.xlu1 %v3388_v23, %s2992_s16 }
0x1ae7   :  { %v1066_v25 = vpop.permute.xlu0 %1065 }
0x1b58   :  { %v1062_v27 = vpop.permute.xlu1 %1061 }
0x1b59   :  { %v1068_v28 = vsel %vm178_vm5, %v1062_v27, %v1066_v25 }
0x1b5a   :  { %v1069_v29 = vpack.c.bf16 %v1068_v28, %v1068_v28 }
0x1b5c   :  { %2659 = vmatmul.mubr.msk.bf16.vlgmr.msra.gmra.mxu0 %vm101_vm1, %v1069_v29 }
0x1b5d   :  { %2675 = vmatpush3.bf16.msra.mxu0 %v3236_v22  ;;  %2682 = vmatprep.mubr.msk.bf16.mxu0 %vm2988_vm0, %v2987_v2 }
0x1b5e   :  { %2676 = vmatprep.subr.bf16.mxu0 %v2987_v2 }
0x1b61   :  { %2677 = vmatpush3.bf16.msra.mxu0 %v3243_v44 }
0x1b62   :  { %2678 = vmatprep.subr.bf16.mxu0 %v2987_v2 }
0x1b65   :  { %2679 = vmatpush3.bf16.msra.mxu0 %v3252_v24 }
0x1b66   :  { %2680 = vmatprep.subr.bf16.mxu0 %v2987_v2 }
0x1b69   :  { %2681 = vmatpush3.bf16.msra.mxu0 %v3259_v26 }
0x1b6a   :  { %2698 = vmatprep.subr.bf16.mxu0 %v2987_v2 }
0x1c1c   :  { %v1107_v62 = vpop.f32.mrf.mxu0 }
0x1c1d   :  { %v1108_v30 = vadd.f32 %v3279_v37, %v1107_v62 }
0x1c1e   :  { %v2660_v31 = vpop.f32.mrf.mxu0 }
0x1c1f   :  { %2906 = vtanh.f32 %v1108_v30  ;;  %v3500_v30 = vld [vmem:[%s3798_s7] ss:$0 sm:$0xff] }
0x1c20   :  { %v1110_v33 = vpop.f32.mrf.mxu0 }
0x1c22   :  { %v2661_v35 = vpop.f32.mrf.mxu0 }
0x1c2c   :  { %v2907_v36 = vpop.eup %2906 }
0x1c2d   :  { %v1114_v39 = vmul.f32 %v2907_v36, %v3129_v32 }
0x1c2f   :  { %v1115_v40 = vadd.f32 %v1114_v39, %v3131_v34 }
0x1c31   :  { %1118 = vrot.lane.b32.xlu1 %v1115_v40, %s2991_s3  ;;  %v1116_v21 = vmul.f32 %v1115_v40, %v1053_v17  ;;  %v3479_v17 = vld [vmem:[%s3797_s6] sm:$0xff]  }
0x1ca3   :  { %v1119_v41 = vpop.permute.xlu1 %1118 }
0x1ca4   :  { %v1121_v43 = vmul.f32 %v1119_v41, %v1115_v40 }
0x1ca6   :  { %1123 = vrot.lane.b32.xlu0 %v1121_v43, %s2992_s16 }
0x1d18   :  { %v1124_v45 = vpop.permute.xlu0 %1123 }
0x1d19   :  { %v1126_v46 = vadd.f32 %v1124_v45, %v1116_v21 }
0x1d1b   :  { %2908 = vtanh.f32 %v1126_v46 }
0x1d28   :  { %v2909_v47 = vpop.eup %2908 }
0x1d29   :  { %1129 = vrot.lane.b32.xlu1 %v2909_v47, %s2991_s3 }
0x1d2d   :  { %1138 = vrot.lane.b32.xlu1 %v3228_v19, %s2991_s3 }
0x1d9b   :  { %v1130_v48 = vpop.permute.xlu1 %1129 }
0x1d9c   :  { %v3412_v49 = vmul.f32 %v1130_v48, %v1115_v40 }
0x1d9e   :  { %1134 = vrot.lane.b32.xlu0 %v3412_v49, %s2992_s16 }
0x1d9f   :  { %v1139_v50 = vpop.permute.xlu1 %1138 }
0x1e10   :  { %v1135_v51 = vpop.permute.xlu0 %1134 }
0x1e11   :  { %v1141_v52 = vsel %vm178_vm5, %v1135_v51, %v1139_v50 }
0x1e12   :  { %v1142_v53 = vpack.c.bf16 %v1141_v52, %v1141_v52 }
0x1e14   :  { %2671 = vmatmul.mubr.msk.bf16.vlgmr.msra.gmra.mxu1 %vm101_vm1, %v1142_v53 }
0x1e15   :  { %2687 = vmatpush3.bf16.msra.mxu1 %v3236_v22  ;;  %2694 = vmatprep.mubr.msk.bf16.mxu1 %vm2988_vm0, %v2987_v2 }
0x1e16   :  { %2688 = vmatprep.subr.bf16.mxu1 %v2987_v2 }
0x1e19   :  { %2689 = vmatpush3.bf16.msra.mxu1 %v3243_v44 }
0x1e1a   :  { %2690 = vmatprep.subr.bf16.mxu1 %v2987_v2 }
0x1e1d   :  { %2691 = vmatpush3.bf16.msra.mxu1 %v3252_v24 }
0x1e1e   :  { %2692 = vmatprep.subr.bf16.mxu1 %v2987_v2 }
0x1e21   :  { %2693 = vmatpush3.bf16.msra.mxu1 %v3259_v26  ;;  %v664_v26 = vld [vmem:[#allocation2 + $0x7] ss:$8 sm:$0xf] }
0x1e22   :  { %2710 = vmatprep.subr.bf16.mxu1 %v2987_v2  ;;  %v712_v0 = vadd.f32 %v3330_v8, %v664_v26 }
0x1ed4   :  { %v1180_v19 = vpop.f32.mrf.mxu1 }
0x1ed5   :  { %v1181_v22 = vadd.f32 %v3279_v37, %v1180_v19 }
0x1ed6   :  { %v2672_v54 = vpop.f32.mrf.mxu1 }
0x1ed7   :  { %2910 = vtanh.f32 %v1181_v22 }
0x1ed8   :  { %v1183_v55 = vpop.f32.mrf.mxu1  ;;  %2912 = vtanh.f32 %v712_v0 }
0x1eda   :  { %v2673_v56 = vpop.f32.mrf.mxu1 }
0x1ee4   :  { %v2911_v58 = vpop.eup %2910 }
0x1ee5   :  { %v1187_v44 = vmul.f32 %v2911_v58, %v3129_v32  ;;  %v2913_v5 = vpop.eup %2912 }
0x1ee6   :  { %v714_v63 = vmul.f32 %v2913_v5, %v3129_v32 }
0x1ee7   :  { %v1188_v59 = vadd.f32 %v1187_v44, %v3131_v34 }
0x1ee8   :  { %v3442_v10 = vadd.f32 %v714_v63, %v3131_v34 }
0x1ee9   :  { %1191 = vrot.lane.b32.xlu0 %v1188_v59, %s2991_s3  ;;  %v1189_v1 = vmul.f32 %v1188_v59, %v1126_v46 }
0x1eea   :  { %v716_v51 = vmul.f32 %v3442_v10, %v3291_v57 }
0x1f5b   :  { %v1192_v24 = vpop.permute.xlu0 %1191 }
0x1f5c   :  { %v1194_v61 = vmul.f32 %v1192_v24, %v1188_v59 }
0x1f5e   :  { %1196 = vrot.lane.b32.xlu1 %v1194_v61, %s2992_s16 }
0x1fd0   :  { %v1197_v4 = vpop.permute.xlu1 %1196 }
0x1fd1   :  { %v3434_v42 = vadd.f32 %v1197_v4, %v1189_v1 }
0x1fd3   :  { %2914 = vtanh.f32 %v3434_v42 }
0x1fe0   :  { %v2915_v7 = vpop.eup %2914 }
0x1fe1   :  { %1202 = vrot.lane.b32.xlu0 %v2915_v7, %s2991_s3 }
0x1fe5   :  { %1211 = vrot.lane.b32.xlu0 %v3296_v3, %s2991_s3  ;;  %v3456_v3 = vld [vmem:[%s3797_s6 + $0x18] sm:$0xff]  }
0x1fe9   :  { %718 = vrot.lane.b32.xlu0 %v3442_v10, %s2991_s3 }
0x2053   :  { %v1203_v8 = vpop.permute.xlu0 %1202 }
0x2054   :  { %v3446_v11 = vmul.f32 %v1203_v8, %v1188_v59 }
0x2056   :  { %1207 = vrot.lane.b32.xlu1 %v3446_v11, %s2992_s16 }
0x2057   :  { %v1212_v12 = vpop.permute.xlu0 %1211 }
0x205a   :  { %1352 = vrot.lane.b32.xlu1 %v3303_v6, %s2991_s3  ;;  %v3472_v6 = vld [vmem:[%s3797_s6 + $0x8] sm:$0xff]  }
0x20c8   :  { %v1208_v13 = vpop.permute.xlu1 %1207 }
0x20c9   :  { %v1214_v14 = vsel %vm178_vm5, %v1208_v13, %v1212_v12 }
0x20ca   :  { %v1215_v9 = vpack.c.bf16 %v1214_v14, %v1214_v14 }
0x20cc   :  { %2683 = vmatmul.mubr.msk.bf16.vlgmr.msra.gmra.mxu0 %vm101_vm1, %v1215_v9  ;;  %v1353_v16 = vpop.permute.xlu1 %1352 }
0x20cd   :  { %2699 = vmatpush3.bf16.msra.mxu0 %v3456_v3  ;;  %2706 = vmatprep.mubr.msk.bf16.mxu0 %vm2988_vm0, %v2987_v2  ;;  %v1355_v18 = vsel %vm178_vm5, 0.0, %v1353_v16 }
0x20ce   :  { %2700 = vmatprep.subr.bf16.mxu0 %v2987_v2  ;;  %v1356_v20 = vpack.c.bf16 %v1355_v18, %v1355_v18 }
0x20d1   :  { %2701 = vmatpush3.bf16.msra.mxu0 %v3463_v15 }
0x20d2   :  { %2702 = vmatprep.subr.bf16.mxu0 %v2987_v2 }
0x20d5   :  { %2703 = vmatpush3.bf16.msra.mxu0 %v3472_v6 }
0x20d6   :  { %2704 = vmatprep.subr.bf16.mxu0 %v2987_v2 }
0x20d9   :  { %2705 = vmatpush3.bf16.msra.mxu0 %v3479_v17 }
0x20da   :  { %2722 = vmatprep.subr.bf16.mxu0 %v2987_v2 }
0x20dc   :  { %2707 = vmatmul.mubr.msk.bf16.vlgmr.msra.gmra.mxu0 %vm101_vm1, %v1356_v20 }
0x20dd   :  { %2723 = vmatpush3.bf16.msra.mxu0 %v3456_v3  ;;  %2730 = vmatprep.mubr.msk.bf16.mxu0 %vm2988_vm0, %v2987_v2 }
0x20de   :  { %2724 = vmatprep.subr.bf16.mxu0 %v2987_v2 }
0x20e1   :  { %2725 = vmatpush3.bf16.msra.mxu0 %v3463_v15 }
0x20e2   :  { %2726 = vmatprep.subr.bf16.mxu0 %v2987_v2 }
0x20e5   :  { %2727 = vmatpush3.bf16.msra.mxu0 %v3472_v6 }
0x20e6   :  { %2728 = vmatprep.subr.bf16.mxu0 %v2987_v2 }
0x20e9   :  { %2729 = vmatpush3.bf16.msra.mxu0 %v3479_v17 }
0x20ea   :  { %2746 = vmatprep.subr.bf16.mxu0 %v2987_v2 }
0x218c   :  { %v1253_v25 = vpop.f32.mrf.mxu0 }
0x218d   :  { %v1254_v27 = vadd.f32 %v3279_v37, %v1253_v25  ;;  %v719_v37 = vpop.permute.xlu0 %718 }
0x218e   :  { %v2684_v28 = vpop.f32.mrf.mxu0  ;;  %v721_v21 = vmul.f32 %v719_v37, %v3442_v10 }
0x218f   :  { %2916 = vtanh.f32 %v1254_v27 }
0x2190   :  { %v1256_v29 = vpop.f32.mrf.mxu0 }
0x2192   :  { %v2685_v62 = vpop.f32.mrf.mxu0 }
0x219c   :  { %v2917_v31 = vpop.eup %2916  ;;  %v1433_v33 = vpop.f32.mrf.mxu0 }
0x219d   :  { %v1434_v35 = vadd.f32 %v3500_v30, %v1433_v33  ;;  %v1260_v36 = vmul.f32 %v2917_v31, %v3129_v32 }
0x219e   :  { %v2708_v39 = vpop.f32.mrf.mxu0 }
0x219f   :  { %2918 = vtanh.f32 %v1434_v35  ;;  %v1261_v40 = vadd.f32 %v1260_v36, %v3131_v34 }
0x21a0   :  { %v1436_v41 = vpop.f32.mrf.mxu0 }
0x21a1   :  { %1264 = vrot.lane.b32.xlu1 %v1261_v40, %s2991_s3  ;;  %v1262_v55 = vmul.f32 %v1261_v40, %v3434_v42 }
0x21a2   :  { %v2709_v43 = vpop.f32.mrf.mxu0 }
0x21a5   :  { %723 = vrot.lane.b32.xlu1 %v721_v21, %s2992_s16 }
0x21ac   :  { %v2919_v45 = vpop.eup %2918 }
0x21ad   :  { %v1440_v46 = vmul.f32 %v2919_v45, %v3129_v32 }
0x21af   :  { %v1441_v47 = vadd.f32 %v1440_v46, %v3131_v34 }
0x21b1   :  { %1444 = vrot.lane.b32.xlu0 %v1441_v47, %s2991_s3  ;;  %v1442_v44 = vmul.f32 0.0, %v1441_v47 }
0x2213   :  { %v1265_v48 = vpop.permute.xlu1 %1264 }
0x2214   :  { %v1267_v50 = vmul.f32 %v1265_v48, %v1261_v40 }
0x2216   :  { %1269 = vrot.lane.b32.xlu0 %v1267_v50, %s2992_s16 }
0x2217   :  { %v724_v52 = vpop.permute.xlu1 %723 }
0x2218   :  { %v726_v53 = vadd.f32 %v724_v52, %v716_v51 }
0x221a   :  { %2920 = vtanh.f32 %v726_v53 }
0x2223   :  { %v1445_v19 = vpop.permute.xlu0 %1444 }
0x2224   :  { %v1447_v22 = vmul.f32 %v1445_v19, %v1441_v47 }
0x2226   :  { %1449 = vrot.lane.b32.xlu1 %v1447_v22, %s2992_s16 }
0x2227   :  { %v2921_v54 = vpop.eup %2920 }
0x2228   :  { %729 = vrot.lane.b32.xlu0 %v2921_v54, %s2991_s3 }
0x2288   :  { %v1270_v56 = vpop.permute.xlu0 %1269 }
0x2289   :  { %v3517_v58 = vadd.f32 %v1270_v56, %v1262_v55 }
0x228b   :  { %2922 = vtanh.f32 %v3517_v58 }
0x2298   :  { %v2923_v59 = vpop.eup %2922  ;;  %v1450_v57 = vpop.permute.xlu1 %1449 }
0x2299   :  { %v1452_v24 = vadd.f32 %v1450_v57, %v1442_v44  ;;  %1275 = vrot.lane.b32.xlu1 %v2923_v59, %s2991_s3 }
0x229a   :  { %v730_v26 = vpop.permute.xlu0 %729 }
0x229b   :  { %2924 = vtanh.f32 %v1452_v24  ;;  %v732_v0 = vmul.f32 %v730_v26, %v3442_v10 }
0x22a8   :  { %v2925_v61 = vpop.eup %2924 }
0x22a9   :  { %1455 = vrot.lane.b32.xlu0 %v2925_v61, %s2991_s3 }
0x22ad   :  { %1284 = vrot.lane.b32.xlu0 %v732_v0, %s2991_s3 }
0x22b1   :  { %1463 = vrot.lane.b32.xlu0 %v3340_v38, %s2991_s3 }
0x230b   :  { %v1276_v1 = vpop.permute.xlu1 %1275 }
0x230c   :  { %v3526_v4 = vmul.f32 %v1276_v1, %v1261_v40 }
0x230e   :  { %1280 = vrot.lane.b32.xlu1 %v3526_v4, %s2992_s16 }
0x231b   :  { %v1456_v42 = vpop.permute.xlu0 %1455 }
0x231c   :  { %v1458_v5 = vmul.f32 %v1456_v42, %v1441_v47 }
0x231e   :  { %1460 = vrot.lane.b32.xlu1 %v1458_v5, %s2992_s16 }
0x231f   :  { %v1285_v7 = vpop.permute.xlu0 %1284 }
0x2323   :  { %v1464_v38 = vpop.permute.xlu0 %1463 }
0x2380   :  { %v1281_v63 = vpop.permute.xlu1 %1280 }
0x2381   :  { %v1287_v8 = vsel %vm178_vm5, %v1281_v63, %v1285_v7 }
0x2382   :  { %v1288_v10 = vpack.c.bf16 %v1287_v8, %v1287_v8 }
0x2384   :  { %2695 = vmatmul.mubr.msk.bf16.vlgmr.msra.gmra.mxu1 %vm101_vm1, %v1288_v10 }
0x2385   :  { %2711 = vmatpush3.bf16.msra.mxu1 %v3456_v3  ;;  %2718 = vmatprep.mubr.msk.bf16.mxu1 %vm2988_vm0, %v2987_v2 }
0x2386   :  { %2712 = vmatprep.subr.bf16.mxu1 %v2987_v2 }
0x2389   :  { %2713 = vmatpush3.bf16.msra.mxu1 %v3463_v15 }
0x238a   :  { %2714 = vmatprep.subr.bf16.mxu1 %v2987_v2 }
0x238d   :  { %2715 = vmatpush3.bf16.msra.mxu1 %v3472_v6 }
0x238e   :  { %2716 = vmatprep.subr.bf16.mxu1 %v2987_v2 }
0x2390   :  { %v3541_v12 = vpop.permute.xlu1 %1460 }
0x2391   :  { %v1466_v13 = vsel %vm178_vm5, %v3541_v12, %v1464_v38  ;;  %2717 = vmatpush3.bf16.msra.mxu1 %v3479_v17 }
0x2392   :  { %v1467_v14 = vpack.c.bf16 %v1466_v13, %v1466_v13  ;;  %2734 = vmatprep.subr.bf16.mxu1 %v2987_v2 }
0x2394   :  { %2719 = vmatmul.mubr.msk.bf16.vlgmr.msra.gmra.mxu1 %vm101_vm1, %v1467_v14 }
0x2395   :  { %2735 = vmatpush3.bf16.msra.mxu1 %v3456_v3  ;;  %2742 = vmatprep.mubr.msk.bf16.mxu1 %vm2988_vm0, %v2987_v2 }
0x2396   :  { %2736 = vmatprep.subr.bf16.mxu1 %v2987_v2 }
0x2399   :  { %2737 = vmatpush3.bf16.msra.mxu1 %v3463_v15 }
0x239a   :  { %2738 = vmatprep.subr.bf16.mxu1 %v2987_v2 }
0x239d   :  { %2739 = vmatpush3.bf16.msra.mxu1 %v3472_v6 }
0x239e   :  { %2740 = vmatprep.subr.bf16.mxu1 %v2987_v2 }
0x23a1   :  { %2741 = vmatpush3.bf16.msra.mxu1 %v3479_v17 }
0x23a2   :  { %2758 = vmatprep.subr.bf16.mxu1 %v2987_v2 }
0x2444   :  { %v3558_v9 = vpop.f32.mrf.mxu1 }
0x2446   :  { %v2696_v16 = vpop.f32.mrf.mxu1 }
0x2448   :  { %v1329_v18 = vpop.f32.mrf.mxu1 }
0x244a   :  { %v2697_v20 = vpop.f32.mrf.mxu1 }
0x2454   :  { %v1505_v25 = vpop.f32.mrf.mxu1 }
0x2455   :  { %v1506_v27 = vadd.f32 %v3500_v30, %v1505_v25 }
0x2456   :  { %v2720_v28 = vpop.f32.mrf.mxu1 }
0x2457   :  { %2926 = vtanh.f32 %v1506_v27 }
0x2458   :  { %v1508_v29 = vpop.f32.mrf.mxu1 }
0x245a   :  { %v2721_v62 = vpop.f32.mrf.mxu1 }
0x2464   :  { %v2927_v31 = vpop.eup %2926 }
0x2465   :  { %v1512_v33 = vmul.f32 %v2927_v31, %v3129_v32 }
0x2467   :  { %v1513_v35 = vadd.f32 %v1512_v33, %v3131_v34 }
0x2469   :  { %1516 = vrot.lane.b32.xlu1 %v1513_v35, %s2991_s3  ;;  %v1514_v40 = vmul.f32 %v1513_v35, %v1452_v24 }
0x24db   :  { %v1517_v36 = vpop.permute.xlu1 %1516 }
0x24dc   :  { %v1519_v39 = vmul.f32 %v1517_v36, %v1513_v35 }
0x24de   :  { %1521 = vrot.lane.b32.xlu0 %v1519_v39, %s2992_s16 }
0x2550   :  { %v1522_v37 = vpop.permute.xlu0 %1521 }
0x2551   :  { %v1524_v41 = vadd.f32 %v1522_v37, %v1514_v40 }
0x2553   :  { %2928 = vtanh.f32 %v1524_v41 }
0x2560   :  { %v2929_v43 = vpop.eup %2928 }
0x2561   :  { %1527 = vrot.lane.b32.xlu1 %v2929_v43, %s2991_s3 }
0x2565   :  { %1535 = vrot.lane.b32.xlu1 %v3364_v60, %s2991_s3 }
0x25d3   :  { %v1528_v21 = vpop.permute.xlu1 %1527 }
0x25d4   :  { %v3568_v45 = vmul.f32 %v1528_v21, %v1513_v35 }
0x25d6   :  { %1532 = vrot.lane.b32.xlu0 %v3568_v45, %s2992_s16 }
0x25d7   :  { %v1536_v46 = vpop.permute.xlu1 %1535 }
0x2648   :  { %v1533_v47 = vpop.permute.xlu0 %1532 }
0x2649   :  { %v1538_v48 = vsel %vm178_vm5, %v1533_v47, %v1536_v46 }
0x264a   :  { %v1539_v50 = vpack.c.bf16 %v1538_v48, %v1538_v48 }
0x264c   :  { %2731 = vmatmul.mubr.msk.bf16.vlgmr.msra.gmra.mxu0 %vm101_vm1, %v1539_v50 }
0x264d   :  { %2747 = vmatpush3.bf16.msra.mxu0 %v3456_v3  ;;  %2754 = vmatprep.mubr.msk.bf16.mxu0 %vm2988_vm0, %v2987_v2 }
0x264e   :  { %2748 = vmatprep.subr.bf16.mxu0 %v2987_v2 }
0x2651   :  { %2749 = vmatpush3.bf16.msra.mxu0 %v3463_v15 }
0x2652   :  { %2750 = vmatprep.subr.bf16.mxu0 %v2987_v2 }
0x2655   :  { %2751 = vmatpush3.bf16.msra.mxu0 %v3472_v6 }
0x2656   :  { %2752 = vmatprep.subr.bf16.mxu0 %v2987_v2 }
0x2659   :  { %2753 = vmatpush3.bf16.msra.mxu0 %v3479_v17 }
0x265a   :  { %2770 = vmatprep.subr.bf16.mxu0 %v2987_v2 }
0x270c   :  { %v1577_v60 = vpop.f32.mrf.mxu0 }
0x270d   :  { %v1578_v51 = vadd.f32 %v3500_v30, %v1577_v60 }
0x270e   :  { %v2732_v52 = vpop.f32.mrf.mxu0 }
0x270f   :  { %2930 = vtanh.f32 %v1578_v51 }
0x2710   :  { %v1580_v53 = vpop.f32.mrf.mxu0 }
0x2712   :  { %v2733_v19 = vpop.f32.mrf.mxu0 }
0x271c   :  { %v2931_v22 = vpop.eup %2930 }
0x271d   :  { %v1584_v54 = vmul.f32 %v2931_v22, %v3129_v32 }
0x271f   :  { %v1585_v55 = vadd.f32 %v1584_v54, %v3131_v34 }
0x2721   :  { %1588 = vrot.lane.b32.xlu0 %v1585_v55, %s2991_s3  ;;  %v1586_v59 = vmul.f32 %v1585_v55, %v1524_v41 }
0x2793   :  { %v1589_v56 = vpop.permute.xlu0 %1588 }
0x2794   :  { %v1591_v44 = vmul.f32 %v1589_v56, %v1585_v55 }
0x2796   :  { %1593 = vrot.lane.b32.xlu1 %v1591_v44, %s2992_s16 }
0x2808   :  { %v1594_v57 = vpop.permute.xlu1 %1593 }
0x2809   :  { %v1596_v24 = vadd.f32 %v1594_v57, %v1586_v59 }
0x280b   :  { %2932 = vtanh.f32 %v1596_v24 }
0x2818   :  { %v2933_v61 = vpop.eup %2932 }
0x2819   :  { %1599 = vrot.lane.b32.xlu0 %v2933_v61, %s2991_s3 }
0x281d   :  { %1607 = vrot.lane.b32.xlu0 %v3388_v23, %s2991_s3 }
0x288b   :  { %v1600_v26 = vpop.permute.xlu0 %1599 }
0x288c   :  { %v3592_v0 = vmul.f32 %v1600_v26, %v1585_v55 }
0x288e   :  { %1604 = vrot.lane.b32.xlu1 %v3592_v0, %s2992_s16 }
0x288f   :  { %v1608_v1 = vpop.permute.xlu0 %1607 }
0x2900   :  { %v1605_v42 = vpop.permute.xlu1 %1604 }
0x2901   :  { %v1610_v5 = vsel %vm178_vm5, %v1605_v42, %v1608_v1 }
0x2902   :  { %v1611_v7 = vpack.c.bf16 %v1610_v5, %v1610_v5 }
0x2904   :  { %2743 = vmatmul.mubr.msk.bf16.vlgmr.msra.gmra.mxu1 %vm101_vm1, %v1611_v7 }
0x2905   :  { %2759 = vmatpush3.bf16.msra.mxu1 %v3456_v3  ;;  %2766 = vmatprep.mubr.msk.bf16.mxu1 %vm2988_vm0, %v2987_v2 }
0x2906   :  { %2760 = vmatprep.subr.bf16.mxu1 %v2987_v2 }
0x2909   :  { %2761 = vmatpush3.bf16.msra.mxu1 %v3463_v15 }
0x290a   :  { %2762 = vmatprep.subr.bf16.mxu1 %v2987_v2 }
0x290d   :  { %2763 = vmatpush3.bf16.msra.mxu1 %v3472_v6 }
0x290e   :  { %2764 = vmatprep.subr.bf16.mxu1 %v2987_v2 }
0x2911   :  { %2765 = vmatpush3.bf16.msra.mxu1 %v3479_v17 }
0x2912   :  { %2782 = vmatprep.subr.bf16.mxu1 %v2987_v2 }
0x29c4   :  { %v1649_v23 = vpop.f32.mrf.mxu1 }
0x29c5   :  { %v1650_v63 = vadd.f32 %v3500_v30, %v1649_v23  ;;  %v2964_v23 = vld [vmem:[%s3796_s5] ss:$0 sm:$0xff] }
0x29c6   :  { %v2744_v8 = vpop.f32.mrf.mxu1 }
0x29c7   :  { %2934 = vtanh.f32 %v1650_v63  ;;  %v1327_v63 = vadd.f32 %v2964_v23, %v3558_v9  ;;  %v2851_v23 = vld [vmem:[%s3799_s8 + $0x18] sm:$0xff]  }
0x29c8   :  { %v1652_v10 = vpop.f32.mrf.mxu1 }
0x29ca   :  { %v2745_v38 = vpop.f32.mrf.mxu1 }
0x29d4   :  { %v2935_v13 = vpop.eup %2934 }
0x29d5   :  { %v1656_v14 = vmul.f32 %v2935_v13, %v3129_v32 }
0x29d7   :  { %v1657_v16 = vadd.f32 %v1656_v14, %v3131_v34 }
0x29d9   :  { %1660 = vrot.lane.b32.xlu1 %v1657_v16, %s2991_s3  ;;  %v1658_v25 = vmul.f32 %v1657_v16, %v1596_v24 }
0x2a4b   :  { %v1661_v18 = vpop.permute.xlu1 %1660 }
0x2a4c   :  { %v1663_v20 = vmul.f32 %v1661_v18, %v1657_v16 }
0x2a4e   :  { %1665 = vrot.lane.b32.xlu0 %v1663_v20, %s2992_s16 }
0x2ac0   :  { %v1666_v27 = vpop.permute.xlu0 %1665 }
0x2ac1   :  { %v1668_v28 = vadd.f32 %v1666_v27, %v1658_v25 }
0x2ac3   :  { %2936 = vtanh.f32 %v1668_v28 }
0x2ad0   :  { %v2937_v29 = vpop.eup %2936 }
0x2ad1   :  { %1671 = vrot.lane.b32.xlu1 %v2937_v29, %s2991_s3 }
0x2ad5   :  { %1679 = vrot.lane.b32.xlu1 %v3412_v49, %s2991_s3 }
0x2b43   :  { %v1672_v62 = vpop.permute.xlu1 %1671 }
0x2b44   :  { %v3616_v31 = vmul.f32 %v1672_v62, %v1657_v16 }
0x2b46   :  { %1676 = vrot.lane.b32.xlu0 %v3616_v31, %s2992_s16 }
0x2b47   :  { %v1680_v33 = vpop.permute.xlu1 %1679 }
0x2bb8   :  { %v1677_v35 = vpop.permute.xlu0 %1676 }
0x2bb9   :  { %v1682_v36 = vsel %vm178_vm5, %v1677_v35, %v1680_v33 }
0x2bba   :  { %v1683_v39 = vpack.c.bf16 %v1682_v36, %v1682_v36 }
0x2bbc   :  { %2755 = vmatmul.mubr.msk.bf16.vlgmr.msra.gmra.mxu0 %vm101_vm1, %v1683_v39 }
0x2bbd   :  { %2771 = vmatpush3.bf16.msra.mxu0 %v3456_v3  ;;  %2778 = vmatprep.mubr.msk.bf16.mxu0 %vm2988_vm0, %v2987_v2 }
0x2bbe   :  { %2772 = vmatprep.subr.bf16.mxu0 %v2987_v2 }
0x2bc1   :  { %2773 = vmatpush3.bf16.msra.mxu0 %v3463_v15 }
0x2bc2   :  { %2774 = vmatprep.subr.bf16.mxu0 %v2987_v2 }
0x2bc5   :  { %2775 = vmatpush3.bf16.msra.mxu0 %v3472_v6 }
0x2bc6   :  { %2776 = vmatprep.subr.bf16.mxu0 %v2987_v2 }
0x2bc9   :  { %2777 = vmatpush3.bf16.msra.mxu0 %v3479_v17 }
0x2c7c   :  { %v1721_v49 = vpop.f32.mrf.mxu0 }
0x2c7d   :  { %v1722_v40 = vadd.f32 %v3500_v30, %v1721_v49 }
0x2c7e   :  { %v2756_v37 = vpop.f32.mrf.mxu0 }
0x2c7f   :  { %2938 = vtanh.f32 %v1722_v40 }
0x2c80   :  { %v1724_v41 = vpop.f32.mrf.mxu0 }
0x2c82   :  { %v2757_v43 = vpop.f32.mrf.mxu0 }
0x2c8c   :  { %v2939_v21 = vpop.eup %2938 }
0x2c8d   :  { %v1728_v46 = vmul.f32 %v2939_v21, %v3129_v32 }
0x2c8f   :  { %v1729_v47 = vadd.f32 %v1728_v46, %v3131_v34 }
0x2c91   :  { %1732 = vrot.lane.b32.xlu0 %v1729_v47, %s2991_s3  ;;  %v1730_v60 = vmul.f32 %v1729_v47, %v1668_v28 }
0x2d03   :  { %v1733_v48 = vpop.permute.xlu0 %1732 }
0x2d04   :  { %v1735_v50 = vmul.f32 %v1733_v48, %v1729_v47 }
0x2d06   :  { %1737 = vrot.lane.b32.xlu1 %v1735_v50, %s2992_s16 }
0x2d78   :  { %v1738_v51 = vpop.permute.xlu1 %1737 }
0x2d79   :  { %v1740_v52 = vadd.f32 %v1738_v51, %v1730_v60 }
0x2d7b   :  { %2940 = vtanh.f32 %v1740_v52 }
0x2d88   :  { %v2941_v53 = vpop.eup %2940 }
0x2d89   :  { %1743 = vrot.lane.b32.xlu0 %v2941_v53, %s2991_s3 }
0x2d8d   :  { %1751 = vrot.lane.b32.xlu0 %v3446_v11, %s2991_s3 }
0x2dfb   :  { %v1744_v19 = vpop.permute.xlu0 %1743 }
0x2dfc   :  { %v1746_v22 = vmul.f32 %v1744_v19, %v1729_v47 }
0x2dfe   :  { %1748 = vrot.lane.b32.xlu1 %v1746_v22, %s2992_s16 }
0x2dff   :  { %v1752_v54 = vpop.permute.xlu0 %1751 }
0x2e70   :  { %v3640_v55 = vpop.permute.xlu1 %1748 }
0x2e71   :  { %v1754_v56 = vsel %vm178_vm5, %v3640_v55, %v1752_v54 }
0x2e72   :  { %v1755_v44 = vpack.c.bf16 %v1754_v56, %v1754_v56 }
0x2e74   :  { %2767 = vmatmul.mubr.msk.bf16.vlgmr.msra.gmra.mxu1 %vm101_vm1, %v1755_v44 }
0x2e75   :  { %2783 = vmatpush3.bf16.msra.mxu1 %v3456_v3  ;;  %2790 = vmatprep.mubr.msk.bf16.mxu1 %vm2988_vm0, %v2987_v2 }
0x2e76   :  { %2784 = vmatprep.subr.bf16.mxu1 %v2987_v2 }
0x2e79   :  { %2785 = vmatpush3.bf16.msra.mxu1 %v3463_v15 }
0x2e7a   :  { %2786 = vmatprep.subr.bf16.mxu1 %v2987_v2 }
0x2e7d   :  { %2787 = vmatpush3.bf16.msra.mxu1 %v3472_v6 }
0x2e7e   :  { %2788 = vmatprep.subr.bf16.mxu1 %v2987_v2 }
0x2e81   :  { %2789 = vmatpush3.bf16.msra.mxu1 %v3479_v17 }
0x2e82   :  { %2794 = vmatprep.subr.bf16.mxu1 %v2987_v2 }
0x2f34   :  { %v1793_v11 = vpop.f32.mrf.mxu1 }
0x2f35   :  { %v1794_v3 = vadd.f32 %v3500_v30, %v1793_v11 }
0x2f36   :  { %v2768_v59 = vpop.f32.mrf.mxu1 }
0x2f37   :  { %2942 = vtanh.f32 %v1794_v3 }
0x2f38   :  { %v1796_v57 = vpop.f32.mrf.mxu1 }
0x2f3a   :  { %v2769_v24 = vpop.f32.mrf.mxu1 }
0x2f44   :  { %v2943_v61 = vpop.eup %2942 }
0x2f45   :  { %v1800_v15 = vmul.f32 %v2943_v61, %v3129_v32 }
0x2f47   :  { %v1801_v26 = vadd.f32 %v1800_v15, %v3131_v34 }
0x2f49   :  { %1804 = vrot.lane.b32.xlu1 %v1801_v26, %s2991_s3  ;;  %v1802_v17 = vmul.f32 %v1801_v26, %v1740_v52 }
0x2fbb   :  { %v1805_v6 = vpop.permute.xlu1 %1804 }
0x2fbc   :  { %v1807_v1 = vmul.f32 %v1805_v6, %v1801_v26 }
0x2fbe   :  { %1809 = vrot.lane.b32.xlu0 %v1807_v1, %s2992_s16  ;;  %v2846_v1 = vld [vmem:[%s3799_s8 + $0x68] sm:$0xff]  }
0x3030   :  { %v1810_v42 = vpop.permute.xlu0 %1809 }
0x3031   :  { %v1812_v5 = vadd.f32 %v1810_v42, %v1802_v17  ;;  %v2847_v17 = vld [vmem:[%s3799_s8 + $0x28] sm:$0xff]   ;;  %v2848_v42 = vld [vmem:[%s3799_s8 + $0x60] sm:$0xff]  }
0x3033   :  { %2944 = vtanh.f32 %v1812_v5 }
0x3034   :  { %2946 = vtanh.f32 %v1327_v63  ;;  %v2852_v63 = vld [vmem:[%s3799_s8 + $0x50] sm:$0xff]  }
0x3040   :  { %v2945_v7 = vpop.eup %2944 }
0x3041   :  { %1815 = vrot.lane.b32.xlu1 %v2945_v7, %s2991_s3  ;;  %v2947_v8 = vpop.eup %2946  ;;  %v2850_v7 = vld [vmem:[%s3799_s8 + $0x58] sm:$0xff]  }
0x3042   :  { %v1333_v13 = vmul.f32 %v2947_v8, %v3129_v32 }
0x3044   :  { %v1334_v14 = vadd.f32 %v1333_v13, %v3131_v34  ;;  %v2853_v13 = vld [vmem:[%s3799_s8 + $0x10] sm:$0xff]  }
0x3045   :  { %1823 = vrot.lane.b32.xlu1 %v3526_v4, %s2991_s3 }
0x3046   :  { %v1335_v27 = vmul.f32 %v1334_v14, %v3517_v58 }
0x30b3   :  { %v1816_v10 = vpop.permute.xlu1 %1815 }
0x30b4   :  { %v3667_v38 = vmul.f32 %v1816_v10, %v1801_v26 }
0x30b6   :  { %1820 = vrot.lane.b32.xlu0 %v3667_v38, %s2992_s16  ;;  %v2818_v6 = vpack.i.bf16 %v3568_v45, %v3667_v38  ;;  %v2845_v45 = vld [vmem:[%s3799_s8 + $0x30] sm:$0xff]  }
0x30b7   :  { %v1824_v4 = vpop.permute.xlu1 %1823 }
0x30ba   :  { %1337 = vrot.lane.b32.xlu0 %v1334_v14, %s2991_s3 }
0x3128   :  { %v1821_v16 = vpop.permute.xlu0 %1820 }
0x3129   :  { %v1826_v18 = vsel %vm178_vm5, %v1821_v16, %v1824_v4  ;;  %v2855_v4 = vld [vmem:[%s3799_s8 + $0x8] sm:$0xff]   ;;  %v2856_v16 = vld [vmem:[%s3799_s8 + $0x40] sm:$0xff]  }
0x312a   :  { %v1827_v20 = vpack.c.bf16 %v1826_v18, %v1826_v18  ;;  %v2857_v18 = vld [vmem:[%s3799_s8] sm:$0xff]  }
0x312c   :  { %v1338_v9 = vpop.permute.xlu0 %1337  ;;  %2779 = vmatmul.mubr.msk.bf16.vlgmr.msra.gmra.mxu0 %vm101_vm1, %v1827_v20 }
0x312d   :  { %v1340_v25 = vmul.f32 %v1338_v9, %v1334_v14 }
0x312f   :  { %1342 = vrot.lane.b32.xlu0 %v1340_v25, %s2992_s16 }
0x31a1   :  { %v1343_v28 = vpop.permute.xlu0 %1342 }
0x31a2   :  { %v1345_v29 = vadd.f32 %v1343_v28, %v1335_v27 }
0x31a4   :  { %2948 = vtanh.f32 %v1345_v29 }
0x31b1   :  { %v2949_v62 = vpop.eup %2948 }
0x31b2   :  { %1348 = vrot.lane.b32.xlu0 %v2949_v62, %s2991_s3 }
0x31ec   :  { %v1865_v33 = vpop.f32.mrf.mxu0 }
0x31ed   :  { %v1866_v35 = vadd.f32 %v3500_v30, %v1865_v33 }
0x31ee   :  { %v2780_v36 = vpop.f32.mrf.mxu0 }
0x31ef   :  { %2950 = vtanh.f32 %v1866_v35 }
0x31f0   :  { %v1868_v39 = vpop.f32.mrf.mxu0 }
0x31f2   :  { %v2781_v49 = vpop.f32.mrf.mxu0 }
0x31fc   :  { %v2951_v40 = vpop.eup %2950 }
0x31fd   :  { %v1872_v37 = vmul.f32 %v2951_v40, %v3129_v32 }
0x31ff   :  { %v1873_v41 = vadd.f32 %v1872_v37, %v3131_v34 }
0x3201   :  { %1876 = vrot.lane.b32.xlu1 %v1873_v41, %s2991_s3  ;;  %v1874_v21 = vmul.f32 %v1873_v41, %v1812_v5  ;;  %v2849_v5 = vld [vmem:[%s3799_s8 + $0x20] sm:$0xff]  }
0x3224   :  { %v1349_v50 = vpop.permute.xlu0 %1348 }
0x3225   :  { %v1351_v60 = vmul.f32 %v1349_v50, %v1334_v14  ;;  %v2854_v14 = vld [vmem:[%s3799_s8 + $0x48] sm:$0xff]  }
0x3273   :  { %v1877_v58 = vpop.permute.xlu1 %1876 }
0x3274   :  { %v1879_v43 = vmul.f32 %v1877_v58, %v1873_v41 }
0x3276   :  { %1881 = vrot.lane.b32.xlu1 %v1879_v43, %s2992_s16 }
0x32e8   :  { %v1882_v46 = vpop.permute.xlu1 %1881 }
0x32e9   :  { %v1884_v47 = vadd.f32 %v1882_v46, %v1874_v21  ;;  %v2858_v21 = vld [vmem:[%s3801_s10 + $0x8] sm:$0xff]  }
0x32eb   :  { %2952 = vtanh.f32 %v1884_v47 }
0x32f8   :  { %v2953_v48 = vpop.eup %2952 }
0x32f9   :  { %1887 = vrot.lane.b32.xlu1 %v2953_v48, %s2991_s3 }
0x32fd   :  { %1896 = vrot.lane.b32.xlu1 %v1351_v60, %s2991_s3 }
0x336b   :  { %v1888_v51 = vpop.permute.xlu1 %1887 }
0x336c   :  { %v3686_v52 = vmul.f32 %v1888_v51, %v1873_v41 }
0x336e   :  { %1892 = vrot.lane.b32.xlu0 %v3686_v52, %s2992_s16  ;;  %v2823_v9 = vpack.i.bf16 %v3592_v0, %v3686_v52  ;;  %v2860_v52 = vld [vmem:[%s3803_s12 + $0x8] sm:$0xff]  }
0x336f   :  { %v1897_v53 = vpop.permute.xlu1 %1896 }
0x33e0   :  { %v1893_v19 = vpop.permute.xlu0 %1892 }
0x33e1   :  { %v1899_v22 = vsel %vm178_vm5, %v1893_v19, %v1897_v53  ;;  %v2861_v19 = vld [vmem:[%s3803_s12] sm:$0xff]  }
0x33e2   :  { %v1900_v54 = vpack.c.bf16 %v1899_v22, %v1899_v22  ;;  %v2379_v22 = vld [vmem:[%s3802_s11] ss:$0 sm:$0xff]  ;;  %s2994_s11 = smov [#allocation3]  }
0x33e3   :  { %s2312_s12 = sshll.u32 %s2994_s11, 4  ;;  %s2313_s12 = int_to_ptr.vmem [resolvable:$true] %s2312_s12 }
0x33e4   :  { %2791 = vmatmul.mubr.msk.bf16.vlgmr.msra.gmra.mxu1 %vm101_vm1, %v1900_v54  ;;  %p2970_p1 = scmp.lt.s32.totalorder %s2313_s12, %s2313_s12 }
0x33e5   :  { %2798 = vmatprep.mubr.msk.bf16.mxu1 %vm2988_vm0, %v2987_v2  ;;  %2795 = vmatpush3.bf16.msra.mxu1 %v2858_v21 }
0x33e6   :  { %2796 = vmatprep.subr.bf16.mxu1 %v2987_v2 }
0x34a4   :  { %v1938_v56 = vpop.f32.mrf.mxu1 }
0x34a5   :  { %v1939_v44 = vadd.f32 %v3500_v30, %v1938_v56  ;;  %v2842_v30 = vld [vmem:[%s3799_s8 + $0x78] sm:$0xff]  }
0x34a6   :  { %v2792_v11 = vpop.f32.mrf.mxu1  ;;  %2498 = vmatprep.subr.bf16.mxu0 %v2842_v30 }
0x34a7   :  { %2954 = vtanh.f32 %v1939_v44 }
0x34a8   :  { %v1941_v3 = vpop.f32.mrf.mxu1 }
0x34aa   :  { %v2793_v59 = vpop.f32.mrf.mxu1 }
0x34b4   :  { %v2955_v57 = vpop.eup %2954 }
0x34b5   :  { %v1945_v24 = vmul.f32 %v2955_v57, %v3129_v32  ;;  %v2843_v32 = vld [vmem:[%s3799_s8 + $0x38] sm:$0xff]  }
0x34b6   :  { %2499 = vmatpush3.bf16.msra.mxu0 %v2843_v32 }
0x34b7   :  { %v1946_v61 = vadd.f32 %v1945_v24, %v3131_v34  ;;  %v2844_v34 = vld [vmem:[%s3799_s8 + $0x70] sm:$0xff]  }
0x34b8   :  { %2500 = vmatprep.subr.bf16.mxu0 %v2844_v34 }
0x34b9   :  { %1949 = vrot.lane.b32.xlu0 %v1946_v61, %s2991_s3  ;;  %v1947_v8 = vmul.f32 %v1946_v61, %v1884_v47 }
0x34ba   :  { %2501 = vmatpush3.bf16.msra.mxu0 %v2845_v45 }
0x34bb   :  { %2502 = vmatprep.subr.bf16.mxu0 %v2846_v1 }
0x34be   :  { %2503 = vmatpush3.bf16.msra.mxu0 %v2847_v17 }
0x34bf   :  { %2504 = vmatprep.subr.bf16.mxu0 %v2848_v42 }
0x34c2   :  { %2505 = vmatpush3.bf16.msra.mxu0 %v2849_v5 }
0x34c3   :  { %2506 = vmatprep.subr.bf16.mxu0 %v2850_v7 }
0x34c6   :  { %2507 = vmatpush3.bf16.msra.mxu0 %v2851_v23 }
0x34c7   :  { %2508 = vmatprep.subr.bf16.mxu0 %v2852_v63 }
0x34ca   :  { %2509 = vmatpush3.bf16.msra.mxu0 %v2853_v13 }
0x34cb   :  { %2510 = vmatprep.subr.bf16.mxu0 %v2854_v14 }
0x34ce   :  { %2511 = vmatpush3.bf16.msra.mxu0 %v2855_v4 }
0x34cf   :  { %2512 = vmatprep.subr.bf16.mxu0 %v2856_v16 }
0x34d2   :  { %2513 = vmatpush3.bf16.msra.mxu0 %v2857_v18 }
0x352b   :  { %v1950_v15 = vpop.permute.xlu0 %1949 }
0x352c   :  { %v1952_v26 = vmul.f32 %v1950_v15, %v1946_v61 }
0x352e   :  { %1954 = vrot.lane.b32.xlu1 %v1952_v26, %s2992_s16 }
0x3532   :  { %2819 = vrot.lane.b32.xlu1 %v2818_v6, %s2991_s3 }
0x35a0   :  { %v1955_v10 = vpop.permute.xlu1 %1954 }
0x35a1   :  { %v1957_v38 = vadd.f32 %v1955_v10, %v1947_v8 }
0x35a3   :  { %2956 = vtanh.f32 %v1957_v38 }
0x35a4   :  { %v2820_v25 = vpop.permute.xlu1 %2819 }
0x35a5   :  { %v2822_v28 = vunpack.i.h.bf16 %v2820_v25  ;;  %v2821_v29 = vunpack.i.l.bf16 %v2820_v25 }
0x35a7   :  { %v1976_v36 = vsel %vm178_vm5, %v3541_v12, %v2822_v28  ;;  %v1980_v39 = vsel %vm178_vm5, %v3640_v55, %v2821_v29  ;;  %v2859_v12 = vld [vmem:[%s3801_s10] sm:$0xff]  }
0x35a8   :  { %2797 = vmatpush3.bf16.msra.mxu1 %v2859_v12 }
0x35a9   :  { %2802 = vmatprep.subr.bf16.mxu1 %v2987_v2 }
0x35b0   :  { %v2957_v20 = vpop.eup %2956 }
0x35b1   :  { %1960 = vrot.lane.b32.xlu0 %v2957_v20, %s2991_s3 }
0x35b5   :  { %2824 = vrot.lane.b32.xlu0 %v2823_v9, %s2993_s4 }
0x3623   :  { %v1961_v27 = vpop.permute.xlu0 %1960 }
0x3624   :  { %v1963_v49 = vmul.f32 %v1961_v27, %v1946_v61 }
0x3627   :  { %v2825_v62 = vpop.permute.xlu0 %2824 }
0x3628   :  { %v2827_v33 = vunpack.i.h.bf16 %v2825_v62  ;;  %v2826_v35 = vunpack.i.l.bf16 %v2825_v62 }
0x362a   :  { %v1977_v40 = vsel %vm101_vm1, %v1976_v36, %v2827_v33  ;;  %v1981_v0 = vsel %vm101_vm1, %v1980_v39, %v2826_v35 }
0x362b   :  { %v1982_v37 = vsel %vm1978_vm6, %v1981_v0, %v1963_v49  ;;  %v1979_v41 = vsel %vm1978_vm6, %v1977_v40, %v3616_v31  ;;  %v2362_v31 = vld [vmem:[%s3800_s9] ss:$0 sm:$0xff] }
0x362c   :  { %v1984_v58 = vpack.c.bf16 %v1982_v37, %v1982_v37  ;;  %v1983_v43 = vpack.c.bf16 %v1979_v41, %v1979_v41 }
0x362e   :  { %2152 = vmatprep.mubr.bf16.mxu0 %v1984_v58 }
0x362f   :  { %2153 = vmatmul.mubr.bf16.vlgmr.msra.gmra.mxu0 %v1983_v43 }
0x36ef   :  { %v2514_v55 = vpop.f32.mrf.mxu0 }
0x36f1   :  { %v2515_v46 = vpop.f32.mrf.mxu0 }
0x36f2   :  { %v2516_v47 = vadd.f32 %v2515_v46, %v2514_v55 }
0x36f3   :  { %v2517_v48 = vpop.f32.mrf.mxu0 }
0x36f4   :  { %v2155_v50 = vadd.f32 %v2516_v47, %v2362_v31 }
0x36f5   :  { %v2518_v60 = vpop.f32.mrf.mxu0 }
0x36f6   :  { %2958 = vtanh.f32 %v2155_v50 }
0x3703   :  { %v2959_v51 = vpop.eup %2958 }
0x3704   :  { %v2161_v53 = vpack.c.bf16 %v2959_v51, %v2959_v51 }
0x3706   :  { %2799 = vmatmul.mubr.msk.bf16.vlgmr.msra.gmra.mxu1 %vm178_vm5, %v2161_v53 }
0x3707   :  { %2803 = vmatpush3.bf16.msra.mxu1 %v2860_v52  ;;  %2806 = vmatprep.mubr.msk.bf16.mxu1 %vm2988_vm0, %v2987_v2 }
0x3708   :  { %2804 = vmatprep.subr.bf16.mxu1 %v2987_v2  ;;  %v2384_v2 = vld [vmem:[%s3804_s13] ss:$0 sm:$0xff]  ;;  %s2965_s13 = scalar_lea.vmem %s2313_s12, 64 }
0x3709   :  { %p2966_p0 = scmp.ne.s32.totalorder %s2313_s12, %s2965_s13  ;;  %p2971_p2 = scmp.lt.s32.totalorder %s2965_s13, %s2965_s13 }
0x370b   :  { %2805 = vmatpush3.bf16.msra.mxu1 %v2861_v19  ;;  %p2972_p3 = por %p2971_p2, %p2970_p1 }
0x370d   :  { %p2973_p4 = pnand %p2972_p3, %p2966_p0 }
0x37c6   :  { %v2222_v54 = vpop.f32.mrf.mxu1 }
0x37c7   :  { %v2223_v56 = vadd.f32 %v2379_v22, %v2222_v54 }
0x37c8   :  { %v2800_v44 = vpop.f32.mrf.mxu1 }
0x37c9   :  { %v2383_v11 = vclamps-f32 %v2223_v56, 1.0 }
0x37ca   :  { %v2225_v3 = vpop.f32.mrf.mxu1 }
0x37cb   :  { %v2230_v59 = vpack.c.bf16 %v2383_v11, %v2383_v11 }
0x37cc   :  { %v2801_v57 = vpop.f32.mrf.mxu1 }
0x37cd   :  { %2807 = vmatmul.mubr.msk.bf16.vlgmr.msra.gmra.mxu1 %vm178_vm5, %v2230_v59 }
0x388d   :  { %v2291_v24 = vpop.f32.mrf.mxu1 }
0x388e   :  { %v2292_v61 = vadd.f32 %v2384_v2, %v2291_v24 }
0x388f   :  { %v2808_v15 = vpop.f32.mrf.mxu1 }
0x3890   :  { %v2297_v26 = vmul.f32 1.442695, %v2292_v61 }
0x3891   :  { %v2294_v6 = vpop.f32.mrf.mxu1 }
0x3892   :  { %2960 = vpow2.f32 %v2297_v26 }
0x3893   :  { %v2809_v30 = vpop.f32.mrf.mxu1 }
0x389f   :  { %v2961_v32 = vpop.eup %2960 }
0x38a0   :  { %v2300_v34 = vsel %vm2299_vm7, %v2961_v32, 0.0 }
0x38a1   :  { %2301 = vadd.xlane.f32.xlu1 %v2300_v34 }
0x392a   :  { %v2302_v45 = vpop.xlane.xlu1 %2301 }
0x392b   :  { %2962 = vrcp.f32 %v2302_v45 }
0x3938   :  { %v2963_v1 = vpop.eup %2962 }
0x3939   :  { %v2304_v17 = vmul.f32 %v2963_v1, %v2961_v32 }
0x393b   :  { %2305 = vst.msk [vmem:[#allocation3] sm:$0xf] %vm2299_vm7, %v2304_v17 }
0x393c   :  { %2976 = shalt.err (!%p2973_p4)
}
0x393d   :  { %2315 = dma.vmem_to_hbm [thread:$0]  %s2313_s12, 64, %s3805_s14, [#allocation4]  }
0x393e   :  { %2985 = dma.done.wait [#allocation4], 64  }
0x393f   :  { %2986 = vsyncadd [#allocation4], 4294967232 }
0x3940   :  { %2319 = vsyncpa [#allocation4], 1 }

</bundles_post_ra>
